<compile_context>
chip_gen: v7x
topology: tpu7x:2x2x1
jax: 0.10.0
libtpu: 0.0.40
codegen_flags: <defaults>
</compile_context>

<pallas_src>
import math
import functools

import jax
import jax.numpy as jnp
from jax.experimental import pallas as pl
from jax.experimental.pallas import tpu as pltpu

NEG_FILL = -1000000000.0
LN_EPS = 1e-5
HEAD_PAD = 128            # each head's lanes are padded to one 128-lane block


# ----------------------------------------------------------------------------
# In-kernel helpers (traced inline)
# ----------------------------------------------------------------------------
def _layernorm(x, gamma, beta):
    mean = jnp.mean(x, axis=-1, keepdims=True)
    var = jnp.mean((x - mean) ** 2, axis=-1, keepdims=True)
    return (x - mean) * jax.lax.rsqrt(var + LN_EPS) * gamma + beta


def _mha(q_wide, k_wide, v_wide, mask_is_zero, wo_wide, *, num_heads, d_model, d_k):
    """Multi-head attention on head-widened, batch-merged slabs.

    q_wide: (Mq, H*128) bf16, k_wide/v_wide: (Mk, H*128) bf16 (padded lanes are
    exactly zero), mask_is_zero: (Mq, Mk) bool (already includes the
    block-diagonal batch structure), wo_wide: (H*128, D) bf16 with zero rows in
    the padded lanes.  Returns (Mq, D) f32 (output-projection bias NOT added).
    """
    scale = 1.0 / math.sqrt(d_k)
    cdt = q_wide.dtype
    m = q_wide.shape[0]
    acc = jnp.zeros((m, d_model), jnp.float32)
    for h in range(num_heads):                       # static unroll (small H)
        lo = h * HEAD_PAD                            # 128-lane aligned slice
        qh = q_wide[:, lo:lo + HEAD_PAD]
        kh = k_wide[:, lo:lo + HEAD_PAD]
        vh = v_wide[:, lo:lo + HEAD_PAD]
        # q @ k^T contracting the full 128-lane block (padded lanes are zero).
        s = jax.lax.dot_general(qh, kh, (((1,), (1,)), ((), ())),
                                preferred_element_type=jnp.float32) * scale
        s = jnp.where(mask_is_zero, NEG_FILL, s)     # masked_fill semantics
        s = s - jnp.max(s, axis=-1, keepdims=True)
        e = jnp.exp(s)
        p = e * (1.0 / jnp.sum(e, axis=-1, keepdims=True))   # exact softmax
        # dropout(p) in eval mode == identity
        ctx = jnp.dot(p.astype(cdt), vh, preferred_element_type=jnp.float32)
        # Fold the output projection per head -> no concat.
        acc = acc + jnp.dot(ctx.astype(cdt), wo_wide[lo:lo + HEAD_PAD, :],
                            preferred_element_type=jnp.float32)
    return acc


# ----------------------------------------------------------------------------
# Fused decoder kernel.  grid = (batch_tiles, num_layers)
# ----------------------------------------------------------------------------
def _decoder_kernel(tgt_ref, mem_ref, tmask_ref, smask_ref,
                    wA_ref, wB_ref, b_ref, fln_ref,
                    out_ref, x_scr,
                    *, num_heads, d_model, d_ff_pad):
    H = num_heads
    HW = H * HEAD_PAD
    D = d_model
    dk = D // H
    cdt = wA_ref.dtype                               # bf16 MXU compute dtype

    layer = pl.program_id(1)

    @pl.when(layer == 0)
    def _():
        x_scr[...] = tgt_ref[...]

    x = x_scr[...]                                   # (Mq, D) f32, VMEM-resident
    mem_c = mem_ref[...]                             # (Mk, D) bf16 (cast outside)

    # Mask comparisons hoisted out of the head loops (one per attention).
    tmz = tmask_ref[...] == 0
    smz = smask_ref[...] == 0

    # ---- packed-slab offsets (all multiples of 128 lanes / 8 sublanes) -------
    oA_qkv, oA_qe, oA_kve, oA_w1 = 0, 3 * HW, 4 * HW, 6 * HW
    oB_wos, oB_woe, oB_w2 = 0, HW, 2 * HW
    ob_qkv, ob_qe, ob_kve, ob_b1 = 0, 3 * HW, 4 * HW, 6 * HW
    ob_bos = 6 * HW + d_ff_pad
    ob_boe = ob_bos + 128
    ob_b2 = ob_boe + 128
    ob_lg = ob_b2 + 128
    ob_lb = ob_lg + 128

    x_c = x.astype(cdt)

    # ---- self-attention: ONE fused head-widened QKV matmul -------------------
    qkv = jnp.dot(x_c, wA_ref[:, oA_qkv:oA_qkv + 3 * HW],
                  preferred_element_type=jnp.float32) + b_ref[:, ob_qkv:ob_qkv + 3 * HW]
    qkv_c = qkv.astype(cdt)                          # single cast, hoisted
    q_s = qkv_c[:, 0:HW]
    k_s = qkv_c[:, HW:2 * HW]
    v_s = qkv_c[:, 2 * HW:3 * HW]
    sa = _mha(q_s, k_s, v_s, tmz, wB_ref[oB_wos:oB_wos + HW, :],
              num_heads=H, d_model=D, d_k=dk)
    sa = sa + b_ref[:, ob_bos:ob_bos + D]            # bias added once

    # ---- cross-attention: Q from sa, fused KV from memory --------------------
    q2 = (jnp.dot(sa.astype(cdt), wA_ref[:, oA_qe:oA_qe + HW],
                  preferred_element_type=jnp.float32)
          + b_ref[:, ob_qe:ob_qe + HW]).astype(cdt)
    kv2 = (jnp.dot(mem_c, wA_ref[:, oA_kve:oA_kve + 2 * HW],
                   preferred_element_type=jnp.float32)
           + b_ref[:, ob_kve:ob_kve + 2 * HW]).astype(cdt)
    k_e = kv2[:, 0:HW]
    v_e = kv2[:, HW:2 * HW]
    ea = _mha(q2, k_e, v_e, smz, wB_ref[oB_woe:oB_woe + HW, :],
              num_heads=H, d_model=D, d_k=dk)
    ea = ea + b_ref[:, ob_boe:ob_boe + D]

    # ---- positionwise FFN + residual + LayerNorm ------------------------------
    hfc = jnp.maximum(
        jnp.dot(ea.astype(cdt), wA_ref[:, oA_w1:oA_w1 + d_ff_pad],
                preferred_element_type=jnp.float32) + b_ref[:, ob_b1:ob_b1 + d_ff_pad],
        0.0)
    y = (jnp.dot(hfc.astype(cdt), wB_ref[oB_w2:oB_w2 + d_ff_pad, :],
                 preferred_element_type=jnp.float32) + b_ref[:, ob_b2:ob_b2 + D])
    x_new = _layernorm(y + ea, b_ref[:, ob_lg:ob_lg + D], b_ref[:, ob_lb:ob_lb + D])
    x_scr[...] = x_new

    # ---- final LayerNorm after the last layer ----------------------------------
    @pl.when(layer == pl.num_programs(1) - 1)
    def _():
        out_ref[...] = _layernorm(x_new, fln_ref[:, 0:D],
                                  fln_ref[:, 128:128 + D]).astype(out_ref.dtype)


# ----------------------------------------------------------------------------
# Parameter packing: logical params -> 3 per-layer slabs + final-LN slab
# ----------------------------------------------------------------------------
def _pack_params(params, num_heads):
    H = num_heads
    wqkv = params["wqkv_self"]                       # (L, D, 3D) bf16
    L, D, _ = wqkv.shape
    dk = D // H
    assert dk <= HEAD_PAD
    d_ff = params["w1"].shape[-1]
    d_ff_pad = ((d_ff + 127) // 128) * 128
    HW = H * HEAD_PAD

    def widen_cols(w, parts):                        # (L, Din, parts*H*dk) -> (L, Din, parts*HW)
        Lw, Din, _ = w.shape
        wh = w.reshape(Lw, Din, parts, H, dk)
        wh = jnp.pad(wh, ((0, 0), (0, 0), (0, 0), (0, 0), (0, HEAD_PAD - dk)))
        return wh.reshape(Lw, Din, parts * HW)

    def widen_rows(w):                               # (L, H*dk, Dout) -> (L, HW, Dout)
        Lw, _, Dout = w.shape
        wh = w.reshape(Lw, H, dk, Dout)
        wh = jnp.pad(wh, ((0, 0), (0, 0), (0, HEAD_PAD - dk), (0, 0)))
        return wh.reshape(Lw, HW, Dout)

    def widen_bias(b, parts):                        # (L, 1, parts*H*dk) -> (L, 1, parts*HW)
        Lb = b.shape[0]
        bh = b.reshape(Lb, 1, parts, H, dk)
        bh = jnp.pad(bh, ((0, 0), (0, 0), (0, 0), (0, 0), (0, HEAD_PAD - dk)))
        return bh.reshape(Lb, 1, parts * HW)

    def pad_last(x, tot):
        return jnp.pad(x, ((0, 0), (0, 0), (0, tot - x.shape[-1])))

    # Weight slab A: row dim = D, lane-concatenated (all offsets multiples of 128).
    wA = jnp.concatenate([
        widen_cols(params["wqkv_self"], 3),          # [0, 3HW)
        widen_cols(params["wq_enc"], 1),             # [3HW, 4HW)
        widen_cols(params["wkv_enc"], 2),            # [4HW, 6HW)
        pad_last(params["w1"], d_ff_pad),            # [6HW, 6HW+d_ff_pad)
    ], axis=-1).astype(jnp.bfloat16)

    # Weight slab B: col dim = D, row-concatenated (row offsets multiples of 128).
    w2p = jnp.pad(params["w2"], ((0, 0), (0, d_ff_pad - d_ff), (0, 0)))
    wB = jnp.concatenate([
        widen_rows(params["wo_self"]),               # rows [0, HW)
        widen_rows(params["wo_enc"]),                # rows [HW, 2HW)
        w2p,                                         # rows [2HW, 2HW+d_ff_pad)
    ], axis=1).astype(jnp.bfloat16)

    # Bias / LayerNorm slab (f32), every component starts at a 128-lane boundary.
    bslab = jnp.concatenate([
        widen_bias(params["bqkv_self"], 3),
        widen_bias(params["bq_enc"], 1),
        widen_bias(params["bkv_enc"], 2),
        pad_last(params["b1"], d_ff_pad),
        pad_last(params["bo_self"], 128),
        pad_last(params["bo_enc"], 128),
        pad_last(params["b2"], 128),
        pad_last(params["ln_gamma"], 128),
        pad_last(params["ln_beta"], 128),
    ], axis=-1).astype(jnp.float32)

    # Final LayerNorm: gamma at lanes [0,128), beta at lanes [128,256).
    fln = jnp.zeros((1, 2 * 128), jnp.float32)
    fln = fln.at[:, :D].set(params["final_gamma"])
    fln = fln.at[:, 128:128 + D].set(params["final_beta"])
    return wA, wB, bslab, fln, d_ff_pad


# ----------------------------------------------------------------------------
# Wrapper
# ----------------------------------------------------------------------------
def transformer_decoder(params, tgt, memory, src_mask, tgt_mask, num_heads,
                        batch_tiles=1):
    B, T, D = tgt.shape
    S = memory.shape[1]
    L = params["wqkv_self"].shape[0]
    H = num_heads
    assert D % H == 0 and B % batch_tiles == 0
    Bt = B // batch_tiles                           # batches per tile
    HW = H * HEAD_PAD

    wA, wB, bslab, fln, d_ff_pad = _pack_params(params, H)
    PA = wA.shape[-1]
    PB = wB.shape[1]
    PBIAS = bslab.shape[-1]

    tgt2 = tgt.reshape(B * T, D)                    # batch flattened into matmul M
    mem2 = memory.reshape(B * S, D).astype(jnp.bfloat16)   # cast hoisted out of kernel

    # Self-attn mask per tile: block-diagonal over the Bt batches in a tile.
    tmask_big = jnp.kron(jnp.eye(Bt, dtype=jnp.float32),
                         tgt_mask.astype(jnp.float32))        # (Bt*T, Bt*T)
    # Cross-attn mask per tile vs FULL memory: zero out other batches' keys.
    bq = jnp.repeat(jnp.arange(B), T).reshape(batch_tiles, Bt * T)
    bk = jnp.repeat(jnp.arange(B), S)
    same_b = (bq[:, :, None] == bk[None, None, :]).astype(jnp.float32)
    smask_big = same_b * jnp.tile(src_mask.astype(jnp.float32),
                                  (Bt, B))[None]               # (tiles, Bt*T, B*S)

    kernel = functools.partial(_decoder_kernel, num_heads=H, d_model=D,
                               d_ff_pad=d_ff_pad)

    out = pl.pallas_call(
        kernel,
        out_shape=jax.ShapeDtypeStruct((B * T, D), jnp.float32),
        grid=(batch_tiles, L),
        in_specs=[
            pl.BlockSpec((Bt * T, D), lambda bt, l: (bt, 0)),            # tgt (per tile)
            pl.BlockSpec((B * S, D), lambda bt, l: (0, 0)),              # memory (full, bf16)
            pl.BlockSpec((Bt * T, Bt * T), lambda bt, l: (0, 0)),        # self mask
            pl.BlockSpec((None, Bt * T, B * S), lambda bt, l: (bt, 0, 0)),  # cross mask
            pl.BlockSpec((None, D, PA), lambda bt, l: (l, 0, 0)),        # weight slab A
            pl.BlockSpec((None, PB, D), lambda bt, l: (l, 0, 0)),        # weight slab B
            pl.BlockSpec((None, 1, PBIAS), lambda bt, l: (l, 0, 0)),     # bias/LN slab
            pl.BlockSpec((1, 256), lambda bt, l: (0, 0)),                # final LN
        ],
        out_specs=pl.BlockSpec((Bt * T, D), lambda bt, l: (bt, 0)),
        scratch_shapes=[pltpu.VMEM((Bt * T, D), jnp.float32)],           # resident activations
        compiler_params=pltpu.CompilerParams(
            dimension_semantics=("parallel", "arbitrary"),   # tiles || cores, layers carry state
            vmem_limit_bytes=32 * 1024 * 1024,
        ),
    )(tgt2, mem2, tmask_big, smask_big, wA, wB, bslab, fln)

    return out.reshape(B, T, D)


# ----------------------------------------------------------------------------
# Parameter init (weights stored pre-transposed (in, out), stacked over layers)
# ----------------------------------------------------------------------------
def _rand(key, shape, dtype=jnp.float32):
    return (jax.random.normal(key, shape, jnp.float32) * 0.05).astype(dtype)


def init_decoder_params(key, d_model, num_layers, d_ff):
    L, D = num_layers, d_model
    ks = jax.random.split(key, 14)
    bf16 = jnp.bfloat16
    return {
        "wqkv_self": _rand(ks[0], (L, D, 3 * D), bf16),
        "bqkv_self": _rand(ks[1], (L, 1, 3 * D)),
        "wo_self":   _rand(ks[2], (L, D, D), bf16),
        "bo_self":   _rand(ks[3], (L, 1, D)),
        "wq_enc":    _rand(ks[4], (L, D, D), bf16),
        "bq_enc":    _rand(ks[5], (L, 1, D)),
        "wkv_enc":   _rand(ks[6], (L, D, 2 * D), bf16),
        "bkv_enc":   _rand(ks[7], (L, 1, 2 * D)),
        "wo_enc":    _rand(ks[8], (L, D, D), bf16),
        "bo_enc":    _rand(ks[9], (L, 1, D)),
        "w1":        _rand(ks[10], (L, D, d_ff), bf16),
        "b1":        _rand(ks[11], (L, 1, d_ff)),
        "w2":        _rand(ks[12], (L, d_ff, D), bf16),
        "b2":        _rand(ks[13], (L, 1, D)),
        "ln_gamma":  jnp.ones((L, 1, D), jnp.float32),   # PyTorch LN default init
        "ln_beta":   jnp.zeros((L, 1, D), jnp.float32),
        "final_gamma": jnp.ones((1, D), jnp.float32),
        "final_beta":  jnp.zeros((1, D), jnp.float32),
    }


# ----------------------------------------------------------------------------
# Pure-JAX reference (same math, bf16 matmul operands) for a correctness check
# ----------------------------------------------------------------------------
def _reference_decoder(params, tgt, memory, src_mask, tgt_mask, num_heads):
    bf16 = jnp.bfloat16

    def ln(x, g, b):
        m = jnp.mean(x, -1, keepdims=True)
        v = jnp.mean((x - m) ** 2, -1, keepdims=True)
        return (x - m) * jax.lax.rsqrt(v + LN_EPS) * g + b

    def proj(x, w, b):
        return jnp.dot(x.astype(bf16), w, preferred_element_type=jnp.float32) + b

    def mha(q, k, v, mask, w_o, b_o):
        B, Tq, D = q.shape
        Tk = k.shape[1]
        dk = D // num_heads
        qh = q.reshape(B, Tq, num_heads, dk).transpose(0, 2, 1, 3)
        kh = k.reshape(B, Tk, num_heads, dk).transpose(0, 2, 1, 3)
        vh = v.reshape(B, Tk, num_heads, dk).transpose(0, 2, 1, 3)
        s = jnp.einsum("bhqd,bhkd->bhqk", qh.astype(bf16), kh.astype(bf16),
                       preferred_element_type=jnp.float32) / math.sqrt(dk)
        s = jnp.where(mask[None, None] == 0, NEG_FILL, s)
        p = jax.nn.softmax(s, axis=-1)
        ctx = jnp.einsum("bhqk,bhkd->bhqd", p.astype(bf16), vh.astype(bf16),
                         preferred_element_type=jnp.float32)
        ctx = ctx.transpose(0, 2, 1, 3).reshape(B, Tq, D)
        return jnp.dot(ctx.astype(bf16), w_o, preferred_element_type=jnp.float32) + b_o

    x = tgt
    D = tgt.shape[-1]
    L = params["wqkv_self"].shape[0]
    for l in range(L):
        qkv = proj(x, params["wqkv_self"][l], params["bqkv_self"][l])
        q, k, v = qkv[..., :D], qkv[..., D:2 * D], qkv[..., 2 * D:]
        sa = mha(q, k, v, tgt_mask, params["wo_self"][l], params["bo_self"][l])
        q2 = proj(sa, params["wq_enc"][l], params["bq_enc"][l])
        kv2 = proj(memory, params["wkv_enc"][l], params["bkv_enc"][l])
        k2, v2 = kv2[..., :D], kv2[..., D:]
        ea = mha(q2, k2, v2, src_mask, params["wo_enc"][l], params["bo_enc"][l])
        h = jax.nn.relu(proj(ea, params["w1"][l], params["b1"][l]))
        y = proj(h, params["w2"][l], params["b2"][l])
        x = ln(y + ea, params["ln_gamma"][l], params["ln_beta"][l])
    return ln(x, params["final_gamma"], params["final_beta"])


# ----------------------------------------------------------------------------
if __name__ == "__main__":
    B, T, S = 2, 8, 12          # batch, tgt seq len, memory (src) seq len
    D, H, L, D_FF = 32, 4, 2, 64

    key = jax.random.PRNGKey(0)
    k_tgt, k_mem, k_par = jax.random.split(key, 3)

    tgt = jax.random.normal(k_tgt, (B, T, D), jnp.float32)
    memory = jax.random.normal(k_mem, (B, S, D), jnp.float32)

    # causal target mask, all-ones source mask (mask == 0 -> -1e9 before softmax)
    tgt_mask = jnp.tril(jnp.ones((T, T), jnp.float32))
    src_mask = jnp.ones((T, S), jnp.float32)

    params = init_decoder_params(k_par, D, L, D_FF)

    ref = jax.block_until_ready(
        _reference_decoder(params, tgt, memory, src_mask, tgt_mask, H))

    # (a) whole batch merged in one tile (block-diagonal batch mask inside kernel)
    out_merged = jax.block_until_ready(
        transformer_decoder(params, tgt, memory, src_mask, tgt_mask, H,
                            batch_tiles=1))
    # (b) batch split across a leading parallel grid axis (2nd TC on v7x)
    out_tiled = jax.block_until_ready(
        transformer_decoder(params, tgt, memory, src_mask, tgt_mask, H,
                            batch_tiles=2))

    for out in (out_merged, out_tiled):
        assert out.shape == (B, T, D)
        assert bool(jnp.all(jnp.isfinite(out)))
        err = float(jnp.max(jnp.abs(out - ref)))
        assert err < 1e-2, err

    print("KERNEL_OK")
</pallas_src>

<mosaic_0001>
module attributes {stable_mosaic.version = 11 : i64} {
  func.func @_decoder_kernel(%arg0: i32, %arg1: i32, %arg2: memref<16x32xf32, #tpu.memory_space<vmem>>, %arg3: memref<24x32xbf16, #tpu.memory_space<vmem>>, %arg4: memref<16x16xf32, #tpu.memory_space<vmem>>, %arg5: memref<1x16x24xf32, #tpu.memory_space<vmem>>, %arg6: memref<1x32x3200xbf16, #tpu.memory_space<vmem>>, %arg7: memref<1x1152x32xbf16, #tpu.memory_space<vmem>>, %arg8: memref<1x1x3840xf32, #tpu.memory_space<vmem>>, %arg9: memref<1x256xf32, #tpu.memory_space<vmem>>, %arg10: memref<16x32xf32, #tpu.memory_space<vmem>>, %arg11: memref<16x32xf32, #tpu.memory_space<vmem>>) attributes {dimension_semantics = [#tpu.dimension_semantics<parallel>, #tpu.dimension_semantics<arbitrary>], iteration_bounds = array<i64: 1, 2>, scalar_prefetch = 0 : i64, scratch_operands = 1 : i64, tpu.core_type = #tpu.core_type<tc>, window_params = [{transform_indices = @transform_0, window_bounds = array<i64: 16, 32>}, {pipeline_mode = #tpu.pipeline_mode<synchronous>, transform_indices = @transform_1, window_bounds = array<i64: 24, 32>}, {pipeline_mode = #tpu.pipeline_mode<synchronous>, transform_indices = @transform_2, window_bounds = array<i64: 16, 16>}, {transform_indices = @transform_3, window_bounds = array<i64: 1, 16, 24>}, {transform_indices = @transform_4, window_bounds = array<i64: 1, 32, 3200>}, {transform_indices = @transform_5, window_bounds = array<i64: 1, 1152, 32>}, {transform_indices = @transform_6, window_bounds = array<i64: 1, 1, 3840>}, {pipeline_mode = #tpu.pipeline_mode<synchronous>, transform_indices = @transform_7, window_bounds = array<i64: 1, 256>}, {transform_indices = @transform_8, window_bounds = array<i64: 16, 32>}]} {
    %c0_i32 = arith.constant 0 : i32
    %0 = arith.cmpi eq, %arg1, %c0_i32 : i32
    %1 = arith.extui %0 : i1 to i32
    %c0_i32_0 = arith.constant 0 : i32
    %2 = arith.cmpi ne, %1, %c0_i32_0 : i32
    scf.if %2 {
      %c0_128 = arith.constant 0 : index
      %c0_129 = arith.constant 0 : index
      %306 = vector.load %arg2[%c0_128, %c0_129] : memref<16x32xf32, #tpu.memory_space<vmem>>, vector<16x32xf32>
      %c0_130 = arith.constant 0 : index
      %c0_131 = arith.constant 0 : index
      %307 = vector.load %arg11[%c0_130, %c0_131] : memref<16x32xf32, #tpu.memory_space<vmem>>, vector<16x32xf32>
      tpu.vector_store %arg11[%c0_130, %c0_131], %306 {strides = array<i32>} : memref<16x32xf32, #tpu.memory_space<vmem>>, vector<16x32xf32>,
    } else {
    }
    %c0 = arith.constant 0 : index
    %c0_1 = arith.constant 0 : index
    %3 = vector.load %arg11[%c0, %c0_1] : memref<16x32xf32, #tpu.memory_space<vmem>>, vector<16x32xf32>
    %c0_2 = arith.constant 0 : index
    %c0_3 = arith.constant 0 : index
    %4 = vector.load %arg3[%c0_2, %c0_3] : memref<24x32xbf16, #tpu.memory_space<vmem>>, vector<24x32xbf16>
    %c0_4 = arith.constant 0 : index
    %c0_5 = arith.constant 0 : index
    %5 = vector.load %arg4[%c0_4, %c0_5] : memref<16x16xf32, #tpu.memory_space<vmem>>, vector<16x16xf32>
    %cst = arith.constant 0.000000e+00 : f32
    %6 = vector.broadcast %cst : f32 to vector<16x16xf32>
    %7 = arith.cmpf oeq, %5, %6 : vector<16x16xf32>
    %c0_6 = arith.constant 0 : index
    %c0_7 = arith.constant 0 : index
    %c0_8 = arith.constant 0 : index
    %8 = vector.load %arg5[%c0_6, %c0_7, %c0_8] : memref<1x16x24xf32, #tpu.memory_space<vmem>>, vector<1x16x24xf32>
    %9 = vector.shape_cast %8 : vector<1x16x24xf32> to vector<16x24xf32>
    %cst_9 = arith.constant 0.000000e+00 : f32
    %10 = vector.broadcast %cst_9 : f32 to vector<16x24xf32>
    %11 = arith.cmpf oeq, %9, %10 : vector<16x24xf32>
    %12 = arith.truncf %3 : vector<16x32xf32> to vector<16x32xbf16>
    %c0_10 = arith.constant 0 : index
    %c0_11 = arith.constant 0 : index
    %c0_12 = arith.constant 0 : index
    %13 = vector.load %arg6[%c0_10, %c0_11, %c0_12] : memref<1x32x3200xbf16, #tpu.memory_space<vmem>>, vector<1x32x1536xbf16>
    %14 = vector.shape_cast %13 : vector<1x32x1536xbf16> to vector<32x1536xbf16>
    %cst_13 = arith.constant dense<0.000000e+00> : vector<16x1536xf32>
    %15 = tpu.matmul %12, %14, %cst_13 {dimension_numbers = #tpu.dot_dimension_numbers<[1], [0], [0], [1], [0, 0, 1, 1], [], []>} : vector<16x32xbf16>, vector<32x1536xbf16>, vector<16x1536xf32> -> vector<16x1536xf32>
    %c0_14 = arith.constant 0 : index
    %c0_15 = arith.constant 0 : index
    %c0_16 = arith.constant 0 : index
    %16 = vector.load %arg8[%c0_14, %c0_15, %c0_16] : memref<1x1x3840xf32, #tpu.memory_space<vmem>>, vector<1x1x1536xf32>
    %17 = vector.shape_cast %16 : vector<1x1x1536xf32> to vector<1x1536xf32>
    %18 = vector.broadcast %17 : vector<1x1536xf32> to vector<16x1536xf32>
    %19 = arith.addf %15, %18 : vector<16x1536xf32>
    %20 = arith.truncf %19 : vector<16x1536xf32> to vector<16x1536xbf16>
    %21 = vector.extract_strided_slice %20 {offsets = [0, 0], sizes = [16, 512], strides = [1, 1]} : vector<16x1536xbf16> to vector<16x512xbf16>
    %22 = vector.extract_strided_slice %20 {offsets = [0, 512], sizes = [16, 512], strides = [1, 1]} : vector<16x1536xbf16> to vector<16x512xbf16>
    %23 = vector.extract_strided_slice %20 {offsets = [0, 1024], sizes = [16, 512], strides = [1, 1]} : vector<16x1536xbf16> to vector<16x512xbf16>
    %c0_17 = arith.constant 0 : index
    %c0_18 = arith.constant 0 : index
    %c0_19 = arith.constant 0 : index
    %24 = vector.load %arg7[%c0_17, %c0_18, %c0_19] : memref<1x1152x32xbf16, #tpu.memory_space<vmem>>, vector<1x512x32xbf16>
    %25 = vector.shape_cast %24 : vector<1x512x32xbf16> to vector<512x32xbf16>
    %cst_20 = arith.constant 0.000000e+00 : f32
    %26 = vector.broadcast %cst_20 : f32 to vector<16x32xf32>
    %27 = vector.extract_strided_slice %21 {offsets = [0, 0], sizes = [16, 128], strides = [1, 1]} : vector<16x512xbf16> to vector<16x128xbf16>
    %28 = vector.extract_strided_slice %22 {offsets = [0, 0], sizes = [16, 128], strides = [1, 1]} : vector<16x512xbf16> to vector<16x128xbf16>
    %29 = vector.extract_strided_slice %23 {offsets = [0, 0], sizes = [16, 128], strides = [1, 1]} : vector<16x512xbf16> to vector<16x128xbf16>
    %cst_21 = arith.constant dense<0.000000e+00> : vector<16x16xf32>
    %30 = tpu.matmul %27, %28, %cst_21 {dimension_numbers = #tpu.dot_dimension_numbers<[1], [1], [0], [0], [0, 0, 1, 0], [], []>} : vector<16x128xbf16>, vector<16x128xbf16>, vector<16x16xf32> -> vector<16x16xf32>
    %cst_22 = arith.constant 0.353553385 : f32
    %31 = vector.broadcast %cst_22 : f32 to vector<16x16xf32>
    %32 = arith.mulf %30, %31 : vector<16x16xf32>
    %cst_23 = arith.constant -1.000000e+09 : f32
    %33 = vector.broadcast %cst_23 : f32 to vector<16x16xf32>
    %34 = arith.select %7, %33, %32 : vector<16x16xi1>, vector<16x16xf32>
    %cst_24 = arith.constant dense<0xFF800000> : vector<16xf32>
    %35 = vector.multi_reduction <maximumf>, %34, %cst_24 [1] : vector<16x16xf32> to vector<16xf32>
    %36 = vector.shape_cast %35 : vector<16xf32> to vector<16x1xf32>
    %37 = vector.broadcast %36 : vector<16x1xf32> to vector<16x16xf32>
    %38 = arith.subf %34, %37 : vector<16x16xf32>
    %39 = math.exp %38 : vector<16x16xf32>
    %cst_25 = arith.constant dense<0.000000e+00> : vector<16xf32>
    %40 = vector.multi_reduction <add>, %39, %cst_25 [1] : vector<16x16xf32> to vector<16xf32>
    %41 = vector.shape_cast %40 : vector<16xf32> to vector<16x1xf32>
    %cst_26 = arith.constant 1.000000e+00 : f32
    %42 = vector.broadcast %cst_26 : f32 to vector<16x1xf32>
    %43 = arith.divf %42, %41 : vector<16x1xf32>
    %44 = vector.broadcast %43 : vector<16x1xf32> to vector<16x16xf32>
    %45 = arith.mulf %39, %44 : vector<16x16xf32>
    %46 = arith.truncf %45 : vector<16x16xf32> to vector<16x16xbf16>
    %cst_27 = arith.constant dense<0.000000e+00> : vector<16x128xf32>
    %47 = tpu.matmul %46, %29, %cst_27 {dimension_numbers = #tpu.dot_dimension_numbers<[1], [0], [0], [1], [0, 0, 1, 1], [], []>} : vector<16x16xbf16>, vector<16x128xbf16>, vector<16x128xf32> -> vector<16x128xf32>
    %48 = arith.truncf %47 : vector<16x128xf32> to vector<16x128xbf16>
    %49 = vector.extract_strided_slice %25 {offsets = [0, 0], sizes = [128, 32], strides = [1, 1]} : vector<512x32xbf16> to vector<128x32xbf16>
    %cst_28 = arith.constant dense<0.000000e+00> : vector<16x32xf32>
    %50 = tpu.matmul %48, %49, %cst_28 {dimension_numbers = #tpu.dot_dimension_numbers<[1], [0], [0], [1], [0, 0, 1, 1], [], []>} : vector<16x128xbf16>, vector<128x32xbf16>, vector<16x32xf32> -> vector<16x32xf32>
    %51 = arith.addf %26, %50 : vector<16x32xf32>
    %52 = vector.extract_strided_slice %21 {offsets = [0, 128], sizes = [16, 128], strides = [1, 1]} : vector<16x512xbf16> to vector<16x128xbf16>
    %53 = vector.extract_strided_slice %22 {offsets = [0, 128], sizes = [16, 128], strides = [1, 1]} : vector<16x512xbf16> to vector<16x128xbf16>
    %54 = vector.extract_strided_slice %23 {offsets = [0, 128], sizes = [16, 128], strides = [1, 1]} : vector<16x512xbf16> to vector<16x128xbf16>
    %cst_29 = arith.constant dense<0.000000e+00> : vector<16x16xf32>
    %55 = tpu.matmul %52, %53, %cst_29 {dimension_numbers = #tpu.dot_dimension_numbers<[1], [1], [0], [0], [0, 0, 1, 0], [], []>} : vector<16x128xbf16>, vector<16x128xbf16>, vector<16x16xf32> -> vector<16x16xf32>
    %cst_30 = arith.constant 0.353553385 : f32
    %56 = vector.broadcast %cst_30 : f32 to vector<16x16xf32>
    %57 = arith.mulf %55, %56 : vector<16x16xf32>
    %cst_31 = arith.constant -1.000000e+09 : f32
    %58 = vector.broadcast %cst_31 : f32 to vector<16x16xf32>
    %59 = arith.select %7, %58, %57 : vector<16x16xi1>, vector<16x16xf32>
    %cst_32 = arith.constant dense<0xFF800000> : vector<16xf32>
    %60 = vector.multi_reduction <maximumf>, %59, %cst_32 [1] : vector<16x16xf32> to vector<16xf32>
    %61 = vector.shape_cast %60 : vector<16xf32> to vector<16x1xf32>
    %62 = vector.broadcast %61 : vector<16x1xf32> to vector<16x16xf32>
    %63 = arith.subf %59, %62 : vector<16x16xf32>
    %64 = math.exp %63 : vector<16x16xf32>
    %cst_33 = arith.constant dense<0.000000e+00> : vector<16xf32>
    %65 = vector.multi_reduction <add>, %64, %cst_33 [1] : vector<16x16xf32> to vector<16xf32>
    %66 = vector.shape_cast %65 : vector<16xf32> to vector<16x1xf32>
    %cst_34 = arith.constant 1.000000e+00 : f32
    %67 = vector.broadcast %cst_34 : f32 to vector<16x1xf32>
    %68 = arith.divf %67, %66 : vector<16x1xf32>
    %69 = vector.broadcast %68 : vector<16x1xf32> to vector<16x16xf32>
    %70 = arith.mulf %64, %69 : vector<16x16xf32>
    %71 = arith.truncf %70 : vector<16x16xf32> to vector<16x16xbf16>
    %cst_35 = arith.constant dense<0.000000e+00> : vector<16x128xf32>
    %72 = tpu.matmul %71, %54, %cst_35 {dimension_numbers = #tpu.dot_dimension_numbers<[1], [0], [0], [1], [0, 0, 1, 1], [], []>} : vector<16x16xbf16>, vector<16x128xbf16>, vector<16x128xf32> -> vector<16x128xf32>
    %73 = arith.truncf %72 : vector<16x128xf32> to vector<16x128xbf16>
    %74 = vector.extract_strided_slice %25 {offsets = [128, 0], sizes = [128, 32], strides = [1, 1]} : vector<512x32xbf16> to vector<128x32xbf16>
    %cst_36 = arith.constant dense<0.000000e+00> : vector<16x32xf32>
    %75 = tpu.matmul %73, %74, %cst_36 {dimension_numbers = #tpu.dot_dimension_numbers<[1], [0], [0], [1], [0, 0, 1, 1], [], []>} : vector<16x128xbf16>, vector<128x32xbf16>, vector<16x32xf32> -> vector<16x32xf32>
    %76 = arith.addf %51, %75 : vector<16x32xf32>
    %77 = vector.extract_strided_slice %21 {offsets = [0, 256], sizes = [16, 128], strides = [1, 1]} : vector<16x512xbf16> to vector<16x128xbf16>
    %78 = vector.extract_strided_slice %22 {offsets = [0, 256], sizes = [16, 128], strides = [1, 1]} : vector<16x512xbf16> to vector<16x128xbf16>
    %79 = vector.extract_strided_slice %23 {offsets = [0, 256], sizes = [16, 128], strides = [1, 1]} : vector<16x512xbf16> to vector<16x128xbf16>
    %cst_37 = arith.constant dense<0.000000e+00> : vector<16x16xf32>
    %80 = tpu.matmul %77, %78, %cst_37 {dimension_numbers = #tpu.dot_dimension_numbers<[1], [1], [0], [0], [0, 0, 1, 0], [], []>} : vector<16x128xbf16>, vector<16x128xbf16>, vector<16x16xf32> -> vector<16x16xf32>
    %cst_38 = arith.constant 0.353553385 : f32
    %81 = vector.broadcast %cst_38 : f32 to vector<16x16xf32>
    %82 = arith.mulf %80, %81 : vector<16x16xf32>
    %cst_39 = arith.constant -1.000000e+09 : f32
    %83 = vector.broadcast %cst_39 : f32 to vector<16x16xf32>
    %84 = arith.select %7, %83, %82 : vector<16x16xi1>, vector<16x16xf32>
    %cst_40 = arith.constant dense<0xFF800000> : vector<16xf32>
    %85 = vector.multi_reduction <maximumf>, %84, %cst_40 [1] : vector<16x16xf32> to vector<16xf32>
    %86 = vector.shape_cast %85 : vector<16xf32> to vector<16x1xf32>
    %87 = vector.broadcast %86 : vector<16x1xf32> to vector<16x16xf32>
    %88 = arith.subf %84, %87 : vector<16x16xf32>
    %89 = math.exp %88 : vector<16x16xf32>
    %cst_41 = arith.constant dense<0.000000e+00> : vector<16xf32>
    %90 = vector.multi_reduction <add>, %89, %cst_41 [1] : vector<16x16xf32> to vector<16xf32>
    %91 = vector.shape_cast %90 : vector<16xf32> to vector<16x1xf32>
    %cst_42 = arith.constant 1.000000e+00 : f32
    %92 = vector.broadcast %cst_42 : f32 to vector<16x1xf32>
    %93 = arith.divf %92, %91 : vector<16x1xf32>
    %94 = vector.broadcast %93 : vector<16x1xf32> to vector<16x16xf32>
    %95 = arith.mulf %89, %94 : vector<16x16xf32>
    %96 = arith.truncf %95 : vector<16x16xf32> to vector<16x16xbf16>
    %cst_43 = arith.constant dense<0.000000e+00> : vector<16x128xf32>
    %97 = tpu.matmul %96, %79, %cst_43 {dimension_numbers = #tpu.dot_dimension_numbers<[1], [0], [0], [1], [0, 0, 1, 1], [], []>} : vector<16x16xbf16>, vector<16x128xbf16>, vector<16x128xf32> -> vector<16x128xf32>
    %98 = arith.truncf %97 : vector<16x128xf32> to vector<16x128xbf16>
    %99 = vector.extract_strided_slice %25 {offsets = [256, 0], sizes = [128, 32], strides = [1, 1]} : vector<512x32xbf16> to vector<128x32xbf16>
    %cst_44 = arith.constant dense<0.000000e+00> : vector<16x32xf32>
    %100 = tpu.matmul %98, %99, %cst_44 {dimension_numbers = #tpu.dot_dimension_numbers<[1], [0], [0], [1], [0, 0, 1, 1], [], []>} : vector<16x128xbf16>, vector<128x32xbf16>, vector<16x32xf32> -> vector<16x32xf32>
    %101 = arith.addf %76, %100 : vector<16x32xf32>
    %102 = vector.extract_strided_slice %21 {offsets = [0, 384], sizes = [16, 128], strides = [1, 1]} : vector<16x512xbf16> to vector<16x128xbf16>
    %103 = vector.extract_strided_slice %22 {offsets = [0, 384], sizes = [16, 128], strides = [1, 1]} : vector<16x512xbf16> to vector<16x128xbf16>
    %104 = vector.extract_strided_slice %23 {offsets = [0, 384], sizes = [16, 128], strides = [1, 1]} : vector<16x512xbf16> to vector<16x128xbf16>
    %cst_45 = arith.constant dense<0.000000e+00> : vector<16x16xf32>
    %105 = tpu.matmul %102, %103, %cst_45 {dimension_numbers = #tpu.dot_dimension_numbers<[1], [1], [0], [0], [0, 0, 1, 0], [], []>} : vector<16x128xbf16>, vector<16x128xbf16>, vector<16x16xf32> -> vector<16x16xf32>
    %cst_46 = arith.constant 0.353553385 : f32
    %106 = vector.broadcast %cst_46 : f32 to vector<16x16xf32>
    %107 = arith.mulf %105, %106 : vector<16x16xf32>
    %cst_47 = arith.constant -1.000000e+09 : f32
    %108 = vector.broadcast %cst_47 : f32 to vector<16x16xf32>
    %109 = arith.select %7, %108, %107 : vector<16x16xi1>, vector<16x16xf32>
    %cst_48 = arith.constant dense<0xFF800000> : vector<16xf32>
    %110 = vector.multi_reduction <maximumf>, %109, %cst_48 [1] : vector<16x16xf32> to vector<16xf32>
    %111 = vector.shape_cast %110 : vector<16xf32> to vector<16x1xf32>
    %112 = vector.broadcast %111 : vector<16x1xf32> to vector<16x16xf32>
    %113 = arith.subf %109, %112 : vector<16x16xf32>
    %114 = math.exp %113 : vector<16x16xf32>
    %cst_49 = arith.constant dense<0.000000e+00> : vector<16xf32>
    %115 = vector.multi_reduction <add>, %114, %cst_49 [1] : vector<16x16xf32> to vector<16xf32>
    %116 = vector.shape_cast %115 : vector<16xf32> to vector<16x1xf32>
    %cst_50 = arith.constant 1.000000e+00 : f32
    %117 = vector.broadcast %cst_50 : f32 to vector<16x1xf32>
    %118 = arith.divf %117, %116 : vector<16x1xf32>
    %119 = vector.broadcast %118 : vector<16x1xf32> to vector<16x16xf32>
    %120 = arith.mulf %114, %119 : vector<16x16xf32>
    %121 = arith.truncf %120 : vector<16x16xf32> to vector<16x16xbf16>
    %cst_51 = arith.constant dense<0.000000e+00> : vector<16x128xf32>
    %122 = tpu.matmul %121, %104, %cst_51 {dimension_numbers = #tpu.dot_dimension_numbers<[1], [0], [0], [1], [0, 0, 1, 1], [], []>} : vector<16x16xbf16>, vector<16x128xbf16>, vector<16x128xf32> -> vector<16x128xf32>
    %123 = arith.truncf %122 : vector<16x128xf32> to vector<16x128xbf16>
    %124 = vector.extract_strided_slice %25 {offsets = [384, 0], sizes = [128, 32], strides = [1, 1]} : vector<512x32xbf16> to vector<128x32xbf16>
    %cst_52 = arith.constant dense<0.000000e+00> : vector<16x32xf32>
    %125 = tpu.matmul %123, %124, %cst_52 {dimension_numbers = #tpu.dot_dimension_numbers<[1], [0], [0], [1], [0, 0, 1, 1], [], []>} : vector<16x128xbf16>, vector<128x32xbf16>, vector<16x32xf32> -> vector<16x32xf32>
    %126 = arith.addf %101, %125 : vector<16x32xf32>
    %c0_53 = arith.constant 0 : index
    %c0_54 = arith.constant 0 : index
    %c3200 = arith.constant 3200 : index
    %127 = vector.load %arg8[%c0_53, %c0_54, %c3200] : memref<1x1x3840xf32, #tpu.memory_space<vmem>>, vector<1x1x32xf32>
    %128 = vector.shape_cast %127 : vector<1x1x32xf32> to vector<1x32xf32>
    %129 = vector.broadcast %128 : vector<1x32xf32> to vector<16x32xf32>
    %130 = arith.addf %126, %129 : vector<16x32xf32>
    %131 = arith.truncf %130 : vector<16x32xf32> to vector<16x32xbf16>
    %c0_55 = arith.constant 0 : index
    %c0_56 = arith.constant 0 : index
    %c1536 = arith.constant 1536 : index
    %132 = vector.load %arg6[%c0_55, %c0_56, %c1536] : memref<1x32x3200xbf16, #tpu.memory_space<vmem>>, vector<1x32x512xbf16>
    %133 = vector.shape_cast %132 : vector<1x32x512xbf16> to vector<32x512xbf16>
    %cst_57 = arith.constant dense<0.000000e+00> : vector<16x512xf32>
    %134 = tpu.matmul %131, %133, %cst_57 {dimension_numbers = #tpu.dot_dimension_numbers<[1], [0], [0], [1], [0, 0, 1, 1], [], []>} : vector<16x32xbf16>, vector<32x512xbf16>, vector<16x512xf32> -> vector<16x512xf32>
    %c0_58 = arith.constant 0 : index
    %c0_59 = arith.constant 0 : index
    %c1536_60 = arith.constant 1536 : index
    %135 = vector.load %arg8[%c0_58, %c0_59, %c1536_60] : memref<1x1x3840xf32, #tpu.memory_space<vmem>>, vector<1x1x512xf32>
    %136 = vector.shape_cast %135 : vector<1x1x512xf32> to vector<1x512xf32>
    %137 = vector.broadcast %136 : vector<1x512xf32> to vector<16x512xf32>
    %138 = arith.addf %134, %137 : vector<16x512xf32>
    %139 = arith.truncf %138 : vector<16x512xf32> to vector<16x512xbf16>
    %c0_61 = arith.constant 0 : index
    %c0_62 = arith.constant 0 : index
    %c2048 = arith.constant 2048 : index
    %140 = vector.load %arg6[%c0_61, %c0_62, %c2048] : memref<1x32x3200xbf16, #tpu.memory_space<vmem>>, vector<1x32x1024xbf16>
    %141 = vector.shape_cast %140 : vector<1x32x1024xbf16> to vector<32x1024xbf16>
    %cst_63 = arith.constant dense<0.000000e+00> : vector<24x1024xf32>
    %142 = tpu.matmul %4, %141, %cst_63 {dimension_numbers = #tpu.dot_dimension_numbers<[1], [0], [0], [1], [0, 0, 1, 1], [], []>} : vector<24x32xbf16>, vector<32x1024xbf16>, vector<24x1024xf32> -> vector<24x1024xf32>
    %c0_64 = arith.constant 0 : index
    %c0_65 = arith.constant 0 : index
    %c2048_66 = arith.constant 2048 : index
    %143 = vector.load %arg8[%c0_64, %c0_65, %c2048_66] : memref<1x1x3840xf32, #tpu.memory_space<vmem>>, vector<1x1x1024xf32>
    %144 = vector.shape_cast %143 : vector<1x1x1024xf32> to vector<1x1024xf32>
    %145 = vector.broadcast %144 : vector<1x1024xf32> to vector<24x1024xf32>
    %146 = arith.addf %142, %145 : vector<24x1024xf32>
    %147 = arith.truncf %146 : vector<24x1024xf32> to vector<24x1024xbf16>
    %148 = vector.extract_strided_slice %147 {offsets = [0, 0], sizes = [24, 512], strides = [1, 1]} : vector<24x1024xbf16> to vector<24x512xbf16>
    %149 = vector.extract_strided_slice %147 {offsets = [0, 512], sizes = [24, 512], strides = [1, 1]} : vector<24x1024xbf16> to vector<24x512xbf16>
    %c0_67 = arith.constant 0 : index
    %c512 = arith.constant 512 : index
    %c0_68 = arith.constant 0 : index
    %150 = vector.load %arg7[%c0_67, %c512, %c0_68] : memref<1x1152x32xbf16, #tpu.memory_space<vmem>>, vector<1x512x32xbf16>
    %151 = vector.shape_cast %150 : vector<1x512x32xbf16> to vector<512x32xbf16>
    %cst_69 = arith.constant 0.000000e+00 : f32
    %152 = vector.broadcast %cst_69 : f32 to vector<16x32xf32>
    %153 = vector.extract_strided_slice %139 {offsets = [0, 0], sizes = [16, 128], strides = [1, 1]} : vector<16x512xbf16> to vector<16x128xbf16>
    %154 = vector.extract_strided_slice %148 {offsets = [0, 0], sizes = [24, 128], strides = [1, 1]} : vector<24x512xbf16> to vector<24x128xbf16>
    %155 = vector.extract_strided_slice %149 {offsets = [0, 0], sizes = [24, 128], strides = [1, 1]} : vector<24x512xbf16> to vector<24x128xbf16>
    %cst_70 = arith.constant dense<0.000000e+00> : vector<16x24xf32>
    %156 = tpu.matmul %153, %154, %cst_70 {dimension_numbers = #tpu.dot_dimension_numbers<[1], [1], [0], [0], [0, 0, 1, 0], [], []>} : vector<16x128xbf16>, vector<24x128xbf16>, vector<16x24xf32> -> vector<16x24xf32>
    %cst_71 = arith.constant 0.353553385 : f32
    %157 = vector.broadcast %cst_71 : f32 to vector<16x24xf32>
    %158 = arith.mulf %156, %157 : vector<16x24xf32>
    %cst_72 = arith.constant -1.000000e+09 : f32
    %159 = vector.broadcast %cst_72 : f32 to vector<16x24xf32>
    %160 = arith.select %11, %159, %158 : vector<16x24xi1>, vector<16x24xf32>
    %cst_73 = arith.constant dense<0xFF800000> : vector<16xf32>
    %161 = vector.multi_reduction <maximumf>, %160, %cst_73 [1] : vector<16x24xf32> to vector<16xf32>
    %162 = vector.shape_cast %161 : vector<16xf32> to vector<16x1xf32>
    %163 = vector.broadcast %162 : vector<16x1xf32> to vector<16x24xf32>
    %164 = arith.subf %160, %163 : vector<16x24xf32>
    %165 = math.exp %164 : vector<16x24xf32>
    %cst_74 = arith.constant dense<0.000000e+00> : vector<16xf32>
    %166 = vector.multi_reduction <add>, %165, %cst_74 [1] : vector<16x24xf32> to vector<16xf32>
    %167 = vector.shape_cast %166 : vector<16xf32> to vector<16x1xf32>
    %cst_75 = arith.constant 1.000000e+00 : f32
    %168 = vector.broadcast %cst_75 : f32 to vector<16x1xf32>
    %169 = arith.divf %168, %167 : vector<16x1xf32>
    %170 = vector.broadcast %169 : vector<16x1xf32> to vector<16x24xf32>
    %171 = arith.mulf %165, %170 : vector<16x24xf32>
    %172 = arith.truncf %171 : vector<16x24xf32> to vector<16x24xbf16>
    %cst_76 = arith.constant dense<0.000000e+00> : vector<16x128xf32>
    %173 = tpu.matmul %172, %155, %cst_76 {dimension_numbers = #tpu.dot_dimension_numbers<[1], [0], [0], [1], [0, 0, 1, 1], [], []>} : vector<16x24xbf16>, vector<24x128xbf16>, vector<16x128xf32> -> vector<16x128xf32>
    %174 = arith.truncf %173 : vector<16x128xf32> to vector<16x128xbf16>
    %175 = vector.extract_strided_slice %151 {offsets = [0, 0], sizes = [128, 32], strides = [1, 1]} : vector<512x32xbf16> to vector<128x32xbf16>
    %cst_77 = arith.constant dense<0.000000e+00> : vector<16x32xf32>
    %176 = tpu.matmul %174, %175, %cst_77 {dimension_numbers = #tpu.dot_dimension_numbers<[1], [0], [0], [1], [0, 0, 1, 1], [], []>} : vector<16x128xbf16>, vector<128x32xbf16>, vector<16x32xf32> -> vector<16x32xf32>
    %177 = arith.addf %152, %176 : vector<16x32xf32>
    %178 = vector.extract_strided_slice %139 {offsets = [0, 128], sizes = [16, 128], strides = [1, 1]} : vector<16x512xbf16> to vector<16x128xbf16>
    %179 = vector.extract_strided_slice %148 {offsets = [0, 128], sizes = [24, 128], strides = [1, 1]} : vector<24x512xbf16> to vector<24x128xbf16>
    %180 = vector.extract_strided_slice %149 {offsets = [0, 128], sizes = [24, 128], strides = [1, 1]} : vector<24x512xbf16> to vector<24x128xbf16>
    %cst_78 = arith.constant dense<0.000000e+00> : vector<16x24xf32>
    %181 = tpu.matmul %178, %179, %cst_78 {dimension_numbers = #tpu.dot_dimension_numbers<[1], [1], [0], [0], [0, 0, 1, 0], [], []>} : vector<16x128xbf16>, vector<24x128xbf16>, vector<16x24xf32> -> vector<16x24xf32>
    %cst_79 = arith.constant 0.353553385 : f32
    %182 = vector.broadcast %cst_79 : f32 to vector<16x24xf32>
    %183 = arith.mulf %181, %182 : vector<16x24xf32>
    %cst_80 = arith.constant -1.000000e+09 : f32
    %184 = vector.broadcast %cst_80 : f32 to vector<16x24xf32>
    %185 = arith.select %11, %184, %183 : vector<16x24xi1>, vector<16x24xf32>
    %cst_81 = arith.constant dense<0xFF800000> : vector<16xf32>
    %186 = vector.multi_reduction <maximumf>, %185, %cst_81 [1] : vector<16x24xf32> to vector<16xf32>
    %187 = vector.shape_cast %186 : vector<16xf32> to vector<16x1xf32>
    %188 = vector.broadcast %187 : vector<16x1xf32> to vector<16x24xf32>
    %189 = arith.subf %185, %188 : vector<16x24xf32>
    %190 = math.exp %189 : vector<16x24xf32>
    %cst_82 = arith.constant dense<0.000000e+00> : vector<16xf32>
    %191 = vector.multi_reduction <add>, %190, %cst_82 [1] : vector<16x24xf32> to vector<16xf32>
    %192 = vector.shape_cast %191 : vector<16xf32> to vector<16x1xf32>
    %cst_83 = arith.constant 1.000000e+00 : f32
    %193 = vector.broadcast %cst_83 : f32 to vector<16x1xf32>
    %194 = arith.divf %193, %192 : vector<16x1xf32>
    %195 = vector.broadcast %194 : vector<16x1xf32> to vector<16x24xf32>
    %196 = arith.mulf %190, %195 : vector<16x24xf32>
    %197 = arith.truncf %196 : vector<16x24xf32> to vector<16x24xbf16>
    %cst_84 = arith.constant dense<0.000000e+00> : vector<16x128xf32>
    %198 = tpu.matmul %197, %180, %cst_84 {dimension_numbers = #tpu.dot_dimension_numbers<[1], [0], [0], [1], [0, 0, 1, 1], [], []>} : vector<16x24xbf16>, vector<24x128xbf16>, vector<16x128xf32> -> vector<16x128xf32>
    %199 = arith.truncf %198 : vector<16x128xf32> to vector<16x128xbf16>
    %200 = vector.extract_strided_slice %151 {offsets = [128, 0], sizes = [128, 32], strides = [1, 1]} : vector<512x32xbf16> to vector<128x32xbf16>
    %cst_85 = arith.constant dense<0.000000e+00> : vector<16x32xf32>
    %201 = tpu.matmul %199, %200, %cst_85 {dimension_numbers = #tpu.dot_dimension_numbers<[1], [0], [0], [1], [0, 0, 1, 1], [], []>} : vector<16x128xbf16>, vector<128x32xbf16>, vector<16x32xf32> -> vector<16x32xf32>
    %202 = arith.addf %177, %201 : vector<16x32xf32>
    %203 = vector.extract_strided_slice %139 {offsets = [0, 256], sizes = [16, 128], strides = [1, 1]} : vector<16x512xbf16> to vector<16x128xbf16>
    %204 = vector.extract_strided_slice %148 {offsets = [0, 256], sizes = [24, 128], strides = [1, 1]} : vector<24x512xbf16> to vector<24x128xbf16>
    %205 = vector.extract_strided_slice %149 {offsets = [0, 256], sizes = [24, 128], strides = [1, 1]} : vector<24x512xbf16> to vector<24x128xbf16>
    %cst_86 = arith.constant dense<0.000000e+00> : vector<16x24xf32>
    %206 = tpu.matmul %203, %204, %cst_86 {dimension_numbers = #tpu.dot_dimension_numbers<[1], [1], [0], [0], [0, 0, 1, 0], [], []>} : vector<16x128xbf16>, vector<24x128xbf16>, vector<16x24xf32> -> vector<16x24xf32>
    %cst_87 = arith.constant 0.353553385 : f32
    %207 = vector.broadcast %cst_87 : f32 to vector<16x24xf32>
    %208 = arith.mulf %206, %207 : vector<16x24xf32>
    %cst_88 = arith.constant -1.000000e+09 : f32
    %209 = vector.broadcast %cst_88 : f32 to vector<16x24xf32>
    %210 = arith.select %11, %209, %208 : vector<16x24xi1>, vector<16x24xf32>
    %cst_89 = arith.constant dense<0xFF800000> : vector<16xf32>
    %211 = vector.multi_reduction <maximumf>, %210, %cst_89 [1] : vector<16x24xf32> to vector<16xf32>
    %212 = vector.shape_cast %211 : vector<16xf32> to vector<16x1xf32>
    %213 = vector.broadcast %212 : vector<16x1xf32> to vector<16x24xf32>
    %214 = arith.subf %210, %213 : vector<16x24xf32>
    %215 = math.exp %214 : vector<16x24xf32>
    %cst_90 = arith.constant dense<0.000000e+00> : vector<16xf32>
    %216 = vector.multi_reduction <add>, %215, %cst_90 [1] : vector<16x24xf32> to vector<16xf32>
    %217 = vector.shape_cast %216 : vector<16xf32> to vector<16x1xf32>
    %cst_91 = arith.constant 1.000000e+00 : f32
    %218 = vector.broadcast %cst_91 : f32 to vector<16x1xf32>
    %219 = arith.divf %218, %217 : vector<16x1xf32>
    %220 = vector.broadcast %219 : vector<16x1xf32> to vector<16x24xf32>
    %221 = arith.mulf %215, %220 : vector<16x24xf32>
    %222 = arith.truncf %221 : vector<16x24xf32> to vector<16x24xbf16>
    %cst_92 = arith.constant dense<0.000000e+00> : vector<16x128xf32>
    %223 = tpu.matmul %222, %205, %cst_92 {dimension_numbers = #tpu.dot_dimension_numbers<[1], [0], [0], [1], [0, 0, 1, 1], [], []>} : vector<16x24xbf16>, vector<24x128xbf16>, vector<16x128xf32> -> vector<16x128xf32>
    %224 = arith.truncf %223 : vector<16x128xf32> to vector<16x128xbf16>
    %225 = vector.extract_strided_slice %151 {offsets = [256, 0], sizes = [128, 32], strides = [1, 1]} : vector<512x32xbf16> to vector<128x32xbf16>
    %cst_93 = arith.constant dense<0.000000e+00> : vector<16x32xf32>
    %226 = tpu.matmul %224, %225, %cst_93 {dimension_numbers = #tpu.dot_dimension_numbers<[1], [0], [0], [1], [0, 0, 1, 1], [], []>} : vector<16x128xbf16>, vector<128x32xbf16>, vector<16x32xf32> -> vector<16x32xf32>
    %227 = arith.addf %202, %226 : vector<16x32xf32>
    %228 = vector.extract_strided_slice %139 {offsets = [0, 384], sizes = [16, 128], strides = [1, 1]} : vector<16x512xbf16> to vector<16x128xbf16>
    %229 = vector.extract_strided_slice %148 {offsets = [0, 384], sizes = [24, 128], strides = [1, 1]} : vector<24x512xbf16> to vector<24x128xbf16>
    %230 = vector.extract_strided_slice %149 {offsets = [0, 384], sizes = [24, 128], strides = [1, 1]} : vector<24x512xbf16> to vector<24x128xbf16>
    %cst_94 = arith.constant dense<0.000000e+00> : vector<16x24xf32>
    %231 = tpu.matmul %228, %229, %cst_94 {dimension_numbers = #tpu.dot_dimension_numbers<[1], [1], [0], [0], [0, 0, 1, 0], [], []>} : vector<16x128xbf16>, vector<24x128xbf16>, vector<16x24xf32> -> vector<16x24xf32>
    %cst_95 = arith.constant 0.353553385 : f32
    %232 = vector.broadcast %cst_95 : f32 to vector<16x24xf32>
    %233 = arith.mulf %231, %232 : vector<16x24xf32>
    %cst_96 = arith.constant -1.000000e+09 : f32
    %234 = vector.broadcast %cst_96 : f32 to vector<16x24xf32>
    %235 = arith.select %11, %234, %233 : vector<16x24xi1>, vector<16x24xf32>
    %cst_97 = arith.constant dense<0xFF800000> : vector<16xf32>
    %236 = vector.multi_reduction <maximumf>, %235, %cst_97 [1] : vector<16x24xf32> to vector<16xf32>
    %237 = vector.shape_cast %236 : vector<16xf32> to vector<16x1xf32>
    %238 = vector.broadcast %237 : vector<16x1xf32> to vector<16x24xf32>
    %239 = arith.subf %235, %238 : vector<16x24xf32>
    %240 = math.exp %239 : vector<16x24xf32>
    %cst_98 = arith.constant dense<0.000000e+00> : vector<16xf32>
    %241 = vector.multi_reduction <add>, %240, %cst_98 [1] : vector<16x24xf32> to vector<16xf32>
    %242 = vector.shape_cast %241 : vector<16xf32> to vector<16x1xf32>
    %cst_99 = arith.constant 1.000000e+00 : f32
    %243 = vector.broadcast %cst_99 : f32 to vector<16x1xf32>
    %244 = arith.divf %243, %242 : vector<16x1xf32>
    %245 = vector.broadcast %244 : vector<16x1xf32> to vector<16x24xf32>
    %246 = arith.mulf %240, %245 : vector<16x24xf32>
    %247 = arith.truncf %246 : vector<16x24xf32> to vector<16x24xbf16>
    %cst_100 = arith.constant dense<0.000000e+00> : vector<16x128xf32>
    %248 = tpu.matmul %247, %230, %cst_100 {dimension_numbers = #tpu.dot_dimension_numbers<[1], [0], [0], [1], [0, 0, 1, 1], [], []>} : vector<16x24xbf16>, vector<24x128xbf16>, vector<16x128xf32> -> vector<16x128xf32>
    %249 = arith.truncf %248 : vector<16x128xf32> to vector<16x128xbf16>
    %250 = vector.extract_strided_slice %151 {offsets = [384, 0], sizes = [128, 32], strides = [1, 1]} : vector<512x32xbf16> to vector<128x32xbf16>
    %cst_101 = arith.constant dense<0.000000e+00> : vector<16x32xf32>
    %251 = tpu.matmul %249, %250, %cst_101 {dimension_numbers = #tpu.dot_dimension_numbers<[1], [0], [0], [1], [0, 0, 1, 1], [], []>} : vector<16x128xbf16>, vector<128x32xbf16>, vector<16x32xf32> -> vector<16x32xf32>
    %252 = arith.addf %227, %251 : vector<16x32xf32>
    %c0_102 = arith.constant 0 : index
    %c0_103 = arith.constant 0 : index
    %c3328 = arith.constant 3328 : index
    %253 = vector.load %arg8[%c0_102, %c0_103, %c3328] : memref<1x1x3840xf32, #tpu.memory_space<vmem>>, vector<1x1x32xf32>
    %254 = vector.shape_cast %253 : vector<1x1x32xf32> to vector<1x32xf32>
    %255 = vector.broadcast %254 : vector<1x32xf32> to vector<16x32xf32>
    %256 = arith.addf %252, %255 : vector<16x32xf32>
    %257 = arith.truncf %256 : vector<16x32xf32> to vector<16x32xbf16>
    %c0_104 = arith.constant 0 : index
    %c0_105 = arith.constant 0 : index
    %c3072 = arith.constant 3072 : index
    %258 = vector.load %arg6[%c0_104, %c0_105, %c3072] : memref<1x32x3200xbf16, #tpu.memory_space<vmem>>, vector<1x32x128xbf16>
    %259 = vector.shape_cast %258 : vector<1x32x128xbf16> to vector<32x128xbf16>
    %cst_106 = arith.constant dense<0.000000e+00> : vector<16x128xf32>
    %260 = tpu.matmul %257, %259, %cst_106 {dimension_numbers = #tpu.dot_dimension_numbers<[1], [0], [0], [1], [0, 0, 1, 1], [], []>} : vector<16x32xbf16>, vector<32x128xbf16>, vector<16x128xf32> -> vector<16x128xf32>
    %c0_107 = arith.constant 0 : index
    %c0_108 = arith.constant 0 : index
    %c3072_109 = arith.constant 3072 : index
    %261 = vector.load %arg8[%c0_107, %c0_108, %c3072_109] : memref<1x1x3840xf32, #tpu.memory_space<vmem>>, vector<1x1x128xf32>
    %262 = vector.shape_cast %261 : vector<1x1x128xf32> to vector<1x128xf32>
    %263 = vector.broadcast %262 : vector<1x128xf32> to vector<16x128xf32>
    %264 = arith.addf %260, %263 : vector<16x128xf32>
    %cst_110 = arith.constant 0.000000e+00 : f32
    %265 = vector.broadcast %cst_110 : f32 to vector<16x128xf32>
    %266 = arith.maximumf %264, %265 : vector<16x128xf32>
    %267 = arith.truncf %266 : vector<16x128xf32> to vector<16x128xbf16>
    %c0_111 = arith.constant 0 : index
    %c1024 = arith.constant 1024 : index
    %c0_112 = arith.constant 0 : index
    %268 = vector.load %arg7[%c0_111, %c1024, %c0_112] : memref<1x1152x32xbf16, #tpu.memory_space<vmem>>, vector<1x128x32xbf16>
    %269 = vector.shape_cast %268 : vector<1x128x32xbf16> to vector<128x32xbf16>
    %cst_113 = arith.constant dense<0.000000e+00> : vector<16x32xf32>
    %270 = tpu.matmul %267, %269, %cst_113 {dimension_numbers = #tpu.dot_dimension_numbers<[1], [0], [0], [1], [0, 0, 1, 1], [], []>} : vector<16x128xbf16>, vector<128x32xbf16>, vector<16x32xf32> -> vector<16x32xf32>
    %c0_114 = arith.constant 0 : index
    %c0_115 = arith.constant 0 : index
    %c3456 = arith.constant 3456 : index
    %271 = vector.load %arg8[%c0_114, %c0_115, %c3456] : memref<1x1x3840xf32, #tpu.memory_space<vmem>>, vector<1x1x32xf32>
    %272 = vector.shape_cast %271 : vector<1x1x32xf32> to vector<1x32xf32>
    %273 = vector.broadcast %272 : vector<1x32xf32> to vector<16x32xf32>
    %274 = arith.addf %270, %273 : vector<16x32xf32>
    %275 = arith.addf %274, %256 : vector<16x32xf32>
    %c0_116 = arith.constant 0 : index
    %c0_117 = arith.constant 0 : index
    %c3584 = arith.constant 3584 : index
    %276 = vector.load %arg8[%c0_116, %c0_117, %c3584] : memref<1x1x3840xf32, #tpu.memory_space<vmem>>, vector<1x1x32xf32>
    %277 = vector.shape_cast %276 : vector<1x1x32xf32> to vector<1x32xf32>
    %c0_118 = arith.constant 0 : index
    %c0_119 = arith.constant 0 : index
    %c3712 = arith.constant 3712 : index
    %278 = vector.load %arg8[%c0_118, %c0_119, %c3712] : memref<1x1x3840xf32, #tpu.memory_space<vmem>>, vector<1x1x32xf32>
    %279 = vector.shape_cast %278 : vector<1x1x32xf32> to vector<1x32xf32>
    %cst_120 = arith.constant dense<0.000000e+00> : vector<16xf32>
    %280 = vector.multi_reduction <add>, %275, %cst_120 [1] : vector<16x32xf32> to vector<16xf32>
    %281 = vector.shape_cast %280 : vector<16xf32> to vector<16x1xf32>
    %cst_121 = arith.constant 3.200000e+01 : f32
    %282 = vector.broadcast %cst_121 : f32 to vector<16x1xf32>
    %283 = arith.divf %281, %282 : vector<16x1xf32>
    %284 = vector.broadcast %283 : vector<16x1xf32> to vector<16x32xf32>
    %285 = arith.subf %275, %284 : vector<16x32xf32>
    %286 = arith.mulf %285, %285 : vector<16x32xf32>
    %cst_122 = arith.constant dense<0.000000e+00> : vector<16xf32>
    %287 = vector.multi_reduction <add>, %286, %cst_122 [1] : vector<16x32xf32> to vector<16xf32>
    %288 = vector.shape_cast %287 : vector<16xf32> to vector<16x1xf32>
    %cst_123 = arith.constant 3.200000e+01 : f32
    %289 = vector.broadcast %cst_123 : f32 to vector<16x1xf32>
    %290 = arith.divf %288, %289 : vector<16x1xf32>
    %291 = vector.broadcast %283 : vector<16x1xf32> to vector<16x32xf32>
    %292 = arith.subf %275, %291 : vector<16x32xf32>
    %cst_124 = arith.constant 9.99999974E-6 : f32
    %293 = vector.broadcast %cst_124 : f32 to vector<16x1xf32>
    %294 = arith.addf %290, %293 : vector<16x1xf32>
    %295 = math.rsqrt %294 : vector<16x1xf32>
    %296 = vector.broadcast %295 : vector<16x1xf32> to vector<16x32xf32>
    %297 = arith.mulf %292, %296 : vector<16x32xf32>
    %298 = vector.broadcast %277 : vector<1x32xf32> to vector<16x32xf32>
    %299 = arith.mulf %297, %298 : vector<16x32xf32>
    %300 = vector.broadcast %279 : vector<1x32xf32> to vector<16x32xf32>
    %301 = arith.addf %299, %300 : vector<16x32xf32>
    %c0_125 = arith.constant 0 : index
    %c0_126 = arith.constant 0 : index
    %302 = vector.load %arg11[%c0_125, %c0_126] : memref<16x32xf32, #tpu.memory_space<vmem>>, vector<16x32xf32>
    tpu.vector_store %arg11[%c0_125, %c0_126], %301 {strides = array<i32>} : memref<16x32xf32, #tpu.memory_space<vmem>>, vector<16x32xf32>,
    %c1_i32 = arith.constant 1 : i32
    %303 = arith.cmpi eq, %arg1, %c1_i32 : i32
    %304 = arith.extui %303 : i1 to i32
    %c0_i32_127 = arith.constant 0 : i32
    %305 = arith.cmpi ne, %304, %c0_i32_127 : i32
    scf.if %305 {
      %c0_128 = arith.constant 0 : index
      %c0_129 = arith.constant 0 : index
      %306 = vector.load %arg9[%c0_128, %c0_129] : memref<1x256xf32, #tpu.memory_space<vmem>>, vector<1x32xf32>
      %c0_130 = arith.constant 0 : index
      %c128 = arith.constant 128 : index
      %307 = vector.load %arg9[%c0_130, %c128] : memref<1x256xf32, #tpu.memory_space<vmem>>, vector<1x32xf32>
      %cst_131 = arith.constant dense<0.000000e+00> : vector<16xf32>
      %308 = vector.multi_reduction <add>, %301, %cst_131 [1] : vector<16x32xf32> to vector<16xf32>
      %309 = vector.shape_cast %308 : vector<16xf32> to vector<16x1xf32>
      %cst_132 = arith.constant 3.200000e+01 : f32
      %310 = vector.broadcast %cst_132 : f32 to vector<16x1xf32>
      %311 = arith.divf %309, %310 : vector<16x1xf32>
      %312 = vector.broadcast %311 : vector<16x1xf32> to vector<16x32xf32>
      %313 = arith.subf %301, %312 : vector<16x32xf32>
      %314 = arith.mulf %313, %313 : vector<16x32xf32>
      %cst_133 = arith.constant dense<0.000000e+00> : vector<16xf32>
      %315 = vector.multi_reduction <add>, %314, %cst_133 [1] : vector<16x32xf32> to vector<16xf32>
      %316 = vector.shape_cast %315 : vector<16xf32> to vector<16x1xf32>
      %cst_134 = arith.constant 3.200000e+01 : f32
      %317 = vector.broadcast %cst_134 : f32 to vector<16x1xf32>
      %318 = arith.divf %316, %317 : vector<16x1xf32>
      %319 = vector.broadcast %311 : vector<16x1xf32> to vector<16x32xf32>
      %320 = arith.subf %301, %319 : vector<16x32xf32>
      %cst_135 = arith.constant 9.99999974E-6 : f32
      %321 = vector.broadcast %cst_135 : f32 to vector<16x1xf32>
      %322 = arith.addf %318, %321 : vector<16x1xf32>
      %323 = math.rsqrt %322 : vector<16x1xf32>
      %324 = vector.broadcast %323 : vector<16x1xf32> to vector<16x32xf32>
      %325 = arith.mulf %320, %324 : vector<16x32xf32>
      %326 = vector.broadcast %306 : vector<1x32xf32> to vector<16x32xf32>
      %327 = arith.mulf %325, %326 : vector<16x32xf32>
      %328 = vector.broadcast %307 : vector<1x32xf32> to vector<16x32xf32>
      %329 = arith.addf %327, %328 : vector<16x32xf32>
      %c0_136 = arith.constant 0 : index
      %c0_137 = arith.constant 0 : index
      %330 = vector.load %arg10[%c0_136, %c0_137] : memref<16x32xf32, #tpu.memory_space<vmem>>, vector<16x32xf32>
      tpu.vector_store %arg10[%c0_136, %c0_137], %329 {strides = array<i32>} : memref<16x32xf32, #tpu.memory_space<vmem>>, vector<16x32xf32>,
    } else {
    }
    return
  }
  func.func @transform_0(%arg0: i32, %arg1: i32) -> (i32, i32) {
    %c0_i32 = arith.constant 0 : i32
    %c0_i32_0 = arith.constant 0 : i32
    return %arg0, %c0_i32 : i32, i32
  }
  func.func @transform_1(%arg0: i32, %arg1: i32) -> (i32, i32) {
    %c0_i32 = arith.constant 0 : i32
    %c0_i32_0 = arith.constant 0 : i32
    %c0_i32_1 = arith.constant 0 : i32
    return %c0_i32, %c0_i32_0 : i32, i32
  }
  func.func @transform_2(%arg0: i32, %arg1: i32) -> (i32, i32) {
    %c0_i32 = arith.constant 0 : i32
    %c0_i32_0 = arith.constant 0 : i32
    %c0_i32_1 = arith.constant 0 : i32
    return %c0_i32, %c0_i32_0 : i32, i32
  }
  func.func @transform_3(%arg0: i32, %arg1: i32) -> (i32, i32, i32) {
    %c0_i32 = arith.constant 0 : i32
    %c0_i32_0 = arith.constant 0 : i32
    %c0_i32_1 = arith.constant 0 : i32
    return %arg0, %c0_i32, %c0_i32_0 : i32, i32, i32
  }
  func.func @transform_4(%arg0: i32, %arg1: i32) -> (i32, i32, i32) {
    %c0_i32 = arith.constant 0 : i32
    %c0_i32_0 = arith.constant 0 : i32
    %c0_i32_1 = arith.constant 0 : i32
    return %arg1, %c0_i32, %c0_i32_0 : i32, i32, i32
  }
  func.func @transform_5(%arg0: i32, %arg1: i32) -> (i32, i32, i32) {
    %c0_i32 = arith.constant 0 : i32
    %c0_i32_0 = arith.constant 0 : i32
    %c0_i32_1 = arith.constant 0 : i32
    return %arg1, %c0_i32, %c0_i32_0 : i32, i32, i32
  }
  func.func @transform_6(%arg0: i32, %arg1: i32) -> (i32, i32, i32) {
    %c0_i32 = arith.constant 0 : i32
    %c0_i32_0 = arith.constant 0 : i32
    %c0_i32_1 = arith.constant 0 : i32
    return %arg1, %c0_i32, %c0_i32_0 : i32, i32, i32
  }
  func.func @transform_7(%arg0: i32, %arg1: i32) -> (i32, i32) {
    %c0_i32 = arith.constant 0 : i32
    %c0_i32_0 = arith.constant 0 : i32
    %c0_i32_1 = arith.constant 0 : i32
    return %c0_i32, %c0_i32_0 : i32, i32
  }
  func.func @transform_8(%arg0: i32, %arg1: i32) -> (i32, i32) {
    %c0_i32 = arith.constant 0 : i32
    %c0_i32_0 = arith.constant 0 : i32
    return %arg0, %c0_i32 : i32, i32
  }
}

</mosaic_0001>

<bundles_post_ra>
// kernel: tpu_custom_call.1
= control target key start
LH: loop header
LB: loop body
LE: loop exit
PB: predicated region body
PF: predicated region fallthrough
CT: control target
= control target key end

     0   :  { %13 = vsyncpa [#allocation4], 0  ;;  %s4589_s27 = smov 0   ;;  %s4591_s28 = smov 0   ;;  %s5397_s0 = inlined_call_operand.vmem [shape: f32[16,32], index: 0, kind: input, shape index: {}]   ;;  %s5398_s1 = inlined_call_operand.vmem [shape: bf16[24,32], index: 1, kind: input, shape index: {}]   ;;  %s5399_s2 = inlined_call_operand.vmem [shape: f32[16,16], index: 2, kind: input, shape index: {}]   ;;  %s5400_s3 = inlined_call_operand.vmem [shape: f32[1,16,24], index: 3, kind: input, shape index: {}]   ;;  %s5401_s4 = inlined_call_operand.vmem [shape: bf16[2,32,3200], index: 4, kind: input, shape index: {}]   ;;  %s5402_s5 = inlined_call_operand.vmem [shape: bf16[2,1152,32], index: 5, kind: input, shape index: {}]   ;;  %s5403_s6 = inlined_call_operand.vmem [shape: f32[2,1,3840], index: 6, kind: input, shape index: {}]   ;;  %s5404_s7 = inlined_call_operand.vmem [shape: f32[1,256], index: 7, kind: input, shape index: {}]   ;;  %s5405_s8 = inlined_call_operand.hbm [shape: f32[16,32], index: 8, kind: output, shape index: {}]  }
   0x1   :  { %s4593_s29 = smov 0  }
   0x2 LB: > { %s3630_s30 = sadd.s32 4294967295, %s4536_s29   ;;  %s28_s9 = sadd.s32 1, %s4532_s28  ;;  %s4536_s29 = sphi %s4593_s29, %s19_s29   ;;  %s4532_s28 = sphi %s4591_s28, %s5408_s28   ;;  %s4528_s27 = sphi %s4589_s27, %s5407_s27  }
   0x3   : > { %p29_p0 = scmp.ge.s32.totalorder %s28_s9, 2  ;;  %p3635_p1 = scmp.ge.s32.totalorder %s4536_s29, 1 }
   0x4   : > { %p315_p2 = scmp.lt.s32.totalorder %s4536_s29, 3 }
   0x5   : > { %s5410_s9 = smov (%p29_p0, %s28_s9), 0 }
   0x6   : > { %p316_p3 = pnand %p3635_p1, %p315_p2 }
   0x7   : > { %p374_p4 = scmp.lt.s32.totalorder (!%p316_p3), %s4528_s27, 1  ;;  %p3638_p5 = scmp.ne.s32.totalorder (!%p316_p3), %s4528_s27, 0 }
   0x8   : > { %319 = sbr.rel (%p316_p3) target bundleno = 5643 (0x160b), region = 52 }
   0xf   : > { %s375_s10 = scalar_select %p374_p4, %s4528_s27, 1 }
  0x10   : > { %393 = sbr.rel (%p3638_p5) target bundleno = 23 (0x17), region = 56  ;;  %v394_v0 = vld [vmem:[%s5397_s0] sm:$0xff] (!%p3638_p5)  ;;  %vm396_vm0 = vcmask (!%p3638_p5), 261120   ;;  %v395_v1 = vld [vmem:[%s5397_s0 + $0x8] sm:$0xff] (!%p3638_p5) }
  0x11   : > { %s4225_s11 = smul.u32 400, %s375_s10  ;;  %397 = vst.msk [vmem:[#allocation2] sm:$0xff] (!%p3638_p5), %vm396_vm0, %v394_v0  ;;  %398 = vst.msk [vmem:[#allocation2 + $0x8] sm:$0xff] (!%p3638_p5), %vm396_vm0, %v395_v1 }
  0x12   : > { %s4226_s12 = smul.u32 576, %s375_s10 }
  0x13   : > { %s4615_s15 = scalar_lea.vmem %s5401_s4, %s4225_s11  ;;  %s4227_s16 = smul.u32 30, %s375_s10 }
  0x14   : > { %s4620_s19 = scalar_lea.vmem %s5402_s5, %s4226_s12 }
  0x15   : > { %s4625_s22 = scalar_lea.vmem %s5403_s6, %s4227_s16 }
  0x17 PF: > { %v4264_v2 = vld [vmem:[%s4615_s15 + $0x14] ss:$100 sps:$4 sm:$0xff]   ;;  %v4538_v4 = vmov 0   ;;  %v4267_v5 = vld [vmem:[%s4615_s15 + $0xdc] ss:$100 sps:$4 sm:$0xff]   ;;  %vm621_vm1 = vcmask 261120   ;;  %v441_v31 = vlaneseq }
  0x18   : > { %v4266_v3 = vld [vmem:[%s4615_s15 + $0x10] ss:$100 sps:$4 sm:$0xff]   ;;  %743 = vmatprep.mubr.bf16.mxu0 %v4538_v4  ;;  %657 = vmatprep.mubr.bf16.mxu1 %v4538_v4  ;;  %v4269_v6 = vld [vmem:[%s4615_s15 + $0x4] ss:$100 sps:$4 sm:$0xff]   ;;  %v4271_v7 = vld [vmem:[%s4615_s15 + $0xd8] ss:$100 sps:$4 sm:$0xff]  }
  0x19   : > { %711 = vmatprep.subr.bf16.mxu0 %v4264_v2  ;;  %v4272_v8 = vld [vmem:[%s4615_s15] ss:$100 sps:$4 sm:$0xff]   ;;  %v400_v10 = vld [vmem:[#allocation2 + $0x8] sm:$0xff]  ;;  %625 = vmatprep.subr.bf16.mxu1 %v4269_v6  ;;  %v4539_v18 = vmov 0.0   ;;  %vm4540_vm2 = vmmov 0   ;;  %v4676_v32 = vshrl.u32 %v441_v31, 7 }
  0x1a   : > { %712 = vmatpush1.bf16.msra.mxu0 %v4266_v3  ;;  %v399_v9 = vld [vmem:[#allocation2] sm:$0xff]  ;;  %v4273_v11 = vld [vmem:[%s4615_s15 + $0xcc] ss:$100 sps:$4 sm:$0xff]   ;;  %626 = vmatpush1.bf16.msra.mxu1 %v4272_v8  ;;  %v4287_v21 = vld [vmem:[%s4615_s15 + $0xd4] ss:$100 sps:$4 sm:$0xff]   ;;  %vm1004_vm4 = vcmask 130048  }
  0x1b   : > { %713 = vmatprep.subr.bf16.mxu0 %v4267_v5  ;;  %v4275_v12 = vld [vmem:[%s4615_s15 + $0xc8] ss:$100 sps:$4 sm:$0xff]   ;;  %v412_v13 = vpack.c.bf16 %v400_v10, %v399_v9  ;;  %v4276_v14 = vld [vmem:[%s4615_s15 + $0x20] ss:$100 sps:$4 sm:$0xff]   ;;  %627 = vmatprep.subr.bf16.mxu1 %v4273_v11  ;;  %v4285_v22 = vld [vmem:[%s4615_s15 + $0xd0] ss:$100 sps:$4 sm:$0xff]  }
  0x1c   : > { %v4278_v15 = vld [vmem:[%s4615_s15 + $0x24] ss:$100 sps:$4 sm:$0xff]   ;;  %v4281_v16 = vld [vmem:[%s4615_s15 + $0xec] ss:$100 sps:$4 sm:$0xff]   ;;  %v4290_v23 = vld [vmem:[%s4615_s15 + $0x1c] ss:$100 sps:$4 sm:$0xff]  }
  0x1d   : > { %v4279_v17 = vld [vmem:[%s4615_s15 + $0xe8] ss:$100 sps:$4 sm:$0xff]   ;;  %v4288_v24 = vld [vmem:[%s4615_s15 + $0x18] ss:$100 sps:$4 sm:$0xff]   ;;  %v4291_v26 = vld [vmem:[%s4615_s15 + $0xe0] ss:$100 sps:$4 sm:$0xff]  }
  0x1e   : > { %714 = vmatpush1.bf16.msra.mxu0 %v4271_v7  ;;  %628 = vmatpush1.bf16.msra.mxu1 %v4275_v12  ;;  %v4282_v19 = vld [vmem:[%s4615_s15 + $0x8] ss:$100 sps:$4 sm:$0xff]   ;;  %v4299_v29 = vld [vmem:[%s4615_s15 + $0xf4] ss:$100 sps:$4 sm:$0xff]   ;;  %v459_v33 = vsub.s32 4, %v4676_v32  ;;  %v4680_v34 = vld [vmem:[%s4625_s22] sm:$0xff] }
  0x1f   : > { %797 = vmatprep.subr.bf16.mxu0 %v4278_v15  ;;  %v4284_v20 = vld [vmem:[%s4615_s15 + $0xc] ss:$100 sps:$4 sm:$0xff]   ;;  %v4293_v25 = vld [vmem:[%s4615_s15 + $0xe4] ss:$100 sps:$4 sm:$0xff]   ;;  %v463_v35 = vsub.s32 5, %v4676_v32  ;;  %v4684_v36 = vsub.s32 0, %v4676_v32 }
  0x20   : > { %668 = vmatprep.subr.bf16.mxu1 %v4284_v20  ;;  %v4296_v27 = vld [vmem:[%s4615_s15 + $0x2c] ss:$100 sps:$4 sm:$0xff]   ;;  %v4687_v37 = vsub.s32 1, %v4676_v32  ;;  %v460_v38 = vrot.slane %v4680_v34, %v459_v33  ;;  %v4700_v45 = vld [vmem:[%s4625_s22 + $0x8] sm:$0xf]  ;;  %v4722_v12 = vld [vmem:[%s5399_s2] sm:$0xff] }
  0x21   : > { %3665 = vmatmul.mubr.msk.bf16.vlgmr.msra.gmra.mrb[0].mxu0 %vm621_vm1, %v412_v13  ;;  %3663 = vmatmul.mubr.msk.bf16.vlgmr.msra.gmra.mrb[0].mxu1 %vm621_vm1, %v412_v13  ;;  %v4294_v28 = vld [vmem:[%s4615_s15 + $0x28] ss:$100 sps:$4 sm:$0xff]   ;;  %v4297_v30 = vld [vmem:[%s4615_s15 + $0xf0] ss:$100 sps:$4 sm:$0xff]   ;;  %v464_v40 = vrot.slane %v4680_v34, %v463_v35  ;;  %v444_v41 = vrot.slane %v4680_v34, %v4684_v36  ;;  %v476_v57 = vrot.slane %v4700_v45, %v4684_v36  ;;  %vm406_vm3 = vcmp.eq.f32.partialorder %v4722_v12, 0.0  ;;  %p3794_p6 = scmp.ne.s32.totalorder %s4528_s27, 1 }
  0x22   : > { %798 = vmatpush1.bf16.msra.mxu0 %v4276_v14  ;;  %829 = vmatprep.mubr.bf16.mxu0 %v4538_v4  ;;  %v448_v43 = vrot.slane %v4680_v34, %v4687_v37  ;;  %v480_v61 = vrot.slane %v4700_v45, %v4687_v37  ;;  %vm2463_vm6 = vcmask 1043456   ;;  %vm2434_vm8 = vcmask 195584  }
  0x23   : > { %799 = vmatprep.subr.bf16.mxu0 %v4281_v16  ;;  %700 = vmatprep.mubr.bf16.mxu1 %v4538_v4 }
  0x24   : > { %669 = vmatpush1.bf16.msra.mxu1 %v4282_v19 }
  0x25   : > { %670 = vmatprep.subr.bf16.mxu1 %v4287_v21 }
  0x26   : > { %800 = vmatpush1.bf16.msra.mxu0 %v4279_v17 }
  0x27   : > { %3925 = vmatprep.subr.bf16.mxu0 %v4539_v18 }
  0x28   : > { %671 = vmatpush1.bf16.msra.mxu1 %v4285_v22 }
  0x29   : > { %3667 = vmatmul.mubr.msk.bf16.vlgmr.msra.gmra.mrb[4].mxu0 %vm621_vm1, %v412_v13  ;;  %754 = vmatprep.subr.bf16.mxu1 %v4290_v23 }
  0x2a   : > { %3927 = vmatprep.mubr.msk.bf16.mxu0 %vm4540_vm2, %v4539_v18 }
  0x2b   : > { %3664 = vmatmul.mubr.msk.bf16.vlgmr.msra.gmra.mrb[4].mxu1 %vm621_vm1, %v412_v13 }
  0x2c   : > { %755 = vmatpush1.bf16.msra.mxu1 %v4288_v24  ;;  %786 = vmatprep.mubr.bf16.mxu1 %v4538_v4 }
  0x2d   : > { %756 = vmatprep.subr.bf16.mxu1 %v4293_v25 }
  0x30   : > { %757 = vmatpush1.bf16.msra.mxu1 %v4291_v26 }
  0x31   : > { %840 = vmatprep.subr.bf16.mxu1 %v4296_v27 }
  0x33   : > { %3666 = vmatmul.mubr.msk.bf16.vlgmr.msra.gmra.mrb[8].mxu1 %vm621_vm1, %v412_v13 }
  0x34   : > { %841 = vmatpush1.bf16.msra.mxu1 %v4294_v28  ;;  %872 = vmatprep.mubr.bf16.mxu1 %v4538_v4 }
  0x35   : > { %842 = vmatprep.subr.bf16.mxu1 %v4299_v29 }
  0x38   : > { %843 = vmatpush1.bf16.msra.mxu1 %v4297_v30 }
  0x39   : > { %3931 = vmatprep.subr.bf16.mxu1 %v4539_v18 }
  0x3b   : > { %3668 = vmatmul.mubr.msk.bf16.vlgmr.msra.gmra.mrb[12].mxu1 %vm621_vm1, %v412_v13  ;;  %v4727_v13 = vld [vmem:[%s5399_s2 + $0x8] sm:$0xff] }
  0x3c   : > { %3933 = vmatprep.mubr.msk.bf16.mxu1 %vm4540_vm2, %v4539_v18  ;;  %vm407_vm5 = vcmp.eq.f32.partialorder %v4727_v13, 0.0 }
  0xf4   : > { %v745_v39 = vpop.f32.mrb[0].mxu0  ;;  %v659_v49 = vpop.f32.mrb[0].mxu1 }
  0xf5   : > { %v747_v42 = vpop.f32.mrb[1].mxu0  ;;  %v746_v46 = vadd.f32 %v745_v39, %v460_v38  ;;  %v660_v52 = vadd.f32 %v659_v49, %v444_v41  ;;  %v661_v53 = vpop.f32.mrb[1].mxu1 }
  0xf6   : > { %v749_v44 = vpop.f32.mrb[2].mxu0  ;;  %v748_v50 = vadd.f32 %v747_v42, %v464_v40  ;;  %v662_v55 = vadd.f32 %v661_v53, %v448_v43  ;;  %v663_v56 = vpop.f32.mrb[2].mxu1 }
  0xf7   : > { %v750_v47 = vadd.f32 %v749_v44, %v460_v38  ;;  %v751_v48 = vpop.f32.mrb[3].mxu0  ;;  %v664_v59 = vadd.f32 %v663_v56, %v444_v41  ;;  %v665_v60 = vpop.f32.mrb[3].mxu1 }
  0xf8   : > { %v752_v51 = vadd.f32 %v751_v48, %v464_v40  ;;  %v666_v62 = vadd.f32 %v665_v60, %v448_v43 }
  0xf9   : > { %v887_v54 = vpack.c.bf16 %v750_v47, %v746_v46  ;;  %v883_v63 = vpack.c.bf16 %v664_v59, %v660_v52 }
  0xfa   : > { %v888_v58 = vpack.c.bf16 %v752_v51, %v748_v50  ;;  %v884_v1 = vpack.c.bf16 %v666_v62, %v662_v55  ;;  %v4760_v62 = vsub.s32 2, %v4676_v32 }
  0xfb   : > { %3926 = vmatpush3.bf16.xpose.msra.mxu0 %v887_v54 }
  0xfc   : > { %3937 = vmatprep.subr.bf16.mxu0 %v4539_v18  ;;  %v831_v0 = vpop.f32.mrb[4].mxu0 }
  0xfd   : > { %v832_v2 = vadd.f32 %v831_v0, %v476_v57  ;;  %v833_v3 = vpop.f32.mrb[5].mxu0  ;;  %v4763_v0 = vsub.s32 3, %v4676_v32 }
  0xfe   : > { %v4707_v5 = vadd.f32 %v833_v3, %v480_v61  ;;  %v835_v6 = vpop.f32.mrb[6].mxu0  ;;  %v452_v3 = vrot.slane %v4680_v34, %v4760_v62 }
  0xff   : > { %v836_v7 = vadd.f32 %v835_v6, %v476_v57  ;;  %v837_v8 = vpop.f32.mrb[7].mxu0  ;;  %v456_v6 = vrot.slane %v4680_v34, %v4763_v0 }
 0x100   : > { %v4709_v9 = vadd.f32 %v837_v8, %v480_v61 }
 0x101   : > { %v891_v10 = vpack.c.bf16 %v836_v7, %v832_v2 }
 0x102   : > { %3928 = vmatmul.mubr.bf16.vlgmr.msra.gmra.mrb[8].mxu0 %v883_v63  ;;  %v892_v11 = vpack.c.bf16 %v4709_v9, %v4707_v5  ;;  %v702_v63 = vpop.f32.mrb[4].mxu1  ;;  %v4302_v5 = vld [vmem:[%s4620_s19 + $0x8] sm:$0xff]   ;;  %v4304_v9 = vld [vmem:[%s4620_s19 + $0x10] sm:$0xff]  }
 0x103   : > { %3938 = vmatpush3.bf16.xpose.msra.mxu0 %v888_v58  ;;  %3939 = vmatprep.mubr.msk.bf16.mxu0 %vm4540_vm2, %v4539_v18  ;;  %v704_v2 = vpop.f32.mrb[5].mxu1 }
 0x104   : > { %3932 = vmatpush3.bf16.msra.mxu1 %v891_v10  ;;  %3949 = vmatprep.subr.bf16.mxu0 %v4539_v18  ;;  %v706_v7 = vpop.f32.mrb[6].mxu1  ;;  %v4771_v10 = vadd.f32 %v702_v63, %v452_v3 }
 0x105   : > { %3943 = vmatprep.subr.bf16.mxu1 %v4539_v18  ;;  %v708_v8 = vpop.f32.mrb[7].mxu1 }
 0x10a   : > { %3940 = vmatmul.mubr.bf16.vlgmr.msra.gmra.mrb[12].mxu0 %v884_v1  ;;  %v4301_v1 = vld [vmem:[%s4620_s19 + $0x40] sm:$0xff]  }
 0x10b   : > { %3965 = vmatprep.mubr.msk.bf16.mxu0 %vm4540_vm2, %v4539_v18  ;;  %3950 = vmatpush3.bf16.msra.mxu0 %v4301_v1 }
 0x10c   : > { %3951 = vmatprep.subr.bf16.mxu0 %v4539_v18 }
 0x1d5   : > { %v993_v14 = vpop.f32.mrb[8].mxu0 }
 0x1d6   : > { %v1000_v15 = vmul.f32 0.35355338, %v993_v14  ;;  %v3929_v16 = vpop.f32.mrb[9].mxu0  ;;  %v4773_v14 = vadd.f32 %v704_v2, %v456_v6 }
 0x1d7   : > { %v996_v17 = vpop.f32.mrb[10].mxu0  ;;  %v4777_v16 = vadd.f32 %v708_v8, %v456_v6 }
 0x1d8   : > { %v1001_v19 = vmul.f32 0.35355338, %v996_v17  ;;  %v3930_v20 = vpop.f32.mrb[11].mxu0  ;;  %v1002_v21 = vsel %vm406_vm3, -1e+09, %v1000_v15  ;;  %v4775_v15 = vadd.f32 %v706_v7, %v452_v3  ;;  %v4303_v17 = vld [vmem:[%s4620_s19 + $0x48] sm:$0xff]  }
 0x1d9   : > { %v1005_v22 = vsel %vm1004_vm4, %v1002_v21, -inf  ;;  %v886_v20 = vpack.c.bf16 %v4777_v16, %v4773_v14  ;;  %3952 = vmatpush3.bf16.msra.mxu0 %v4303_v17 }
 0x1da   : > { %1006 = vmax.xlane.f32.xlu0 %v1005_v22  ;;  %v1003_v23 = vsel %vm407_vm5, -1e+09, %v1001_v19  ;;  %v885_v19 = vpack.c.bf16 %v4775_v15, %v4771_v10  ;;  %3953 = vmatprep.subr.bf16.mxu0 %v4539_v18  ;;  %v788_v22 = vpop.f32.mrb[8].mxu1 }
 0x1db   : > { %v1008_v25 = vsel %vm1004_vm4, %v1003_v23, -inf }
 0x1dd   : > { %v1109_v24 = vpop.f32.mrb[12].mxu0 }
 0x1de   : > { %v1116_v26 = vmul.f32 0.35355338, %v1109_v24  ;;  %1009 = vmax.xlane.f32.xlu0 %v1008_v25  ;;  %v3941_v27 = vpop.f32.mrb[13].mxu0  ;;  %v4305_v24 = vld [vmem:[%s4620_s19 + $0x50] sm:$0xff]   ;;  %v790_v25 = vpop.f32.mrb[9].mxu1 }
 0x1df   : > { %v1112_v28 = vpop.f32.mrb[14].mxu0  ;;  %3954 = vmatpush3.bf16.msra.mxu0 %v4305_v24  ;;  %v4300_v24 = vld [vmem:[%s4620_s19] sm:$0xff]  }
 0x1e0   : > { %v1117_v29 = vmul.f32 0.35355338, %v1112_v28  ;;  %v3942_v30 = vpop.f32.mrb[15].mxu0  ;;  %v1118_v31 = vsel %vm406_vm3, -1e+09, %v1116_v26  ;;  %v792_v28 = vpop.f32.mrb[10].mxu1  ;;  %3955 = vmatprep.subr.bf16.mxu0 %v4539_v18 }
 0x1e1   : > { %v1120_v38 = vsel %vm1004_vm4, %v1118_v31, -inf }
 0x1e2   : > { %1121 = vmax.xlane.f32.xlu1 %v1120_v38  ;;  %v1119_v39 = vsel %vm407_vm5, -1e+09, %v1117_v29  ;;  %v794_v29 = vpop.f32.mrb[11].mxu1 }
 0x1e3   : > { %v1123_v40 = vsel %vm1004_vm4, %v1119_v39, -inf }
 0x1e6   : > { %1124 = vmax.xlane.f32.xlu1 %v1123_v40  ;;  %v4307_v40 = vld [vmem:[%s4620_s19 + $0x58] sm:$0xff]  }
 0x1e7   : > { %3956 = vmatpush3.bf16.msra.mxu0 %v4307_v40 }
 0x1e8   : > { %3957 = vmatprep.subr.bf16.mxu0 %v4539_v18 }
 0x267   : > { %v1007_v41 = vpop.xlane.xlu0 %1006 }
 0x268   : > { %v1011_v42 = vsub.f32 %v1002_v21, %v1007_v41  ;;  %v467_v21 = vsub.s32 6, %v4676_v32 }
 0x26a   : > { %v1013_v43 = vmul.f32 1.442695, %v1011_v42  ;;  %v468_v26 = vrot.slane %v4680_v34, %v467_v21  ;;  %v484_v42 = vrot.slane %v4700_v45, %v4760_v62 }
 0x26b   : > { %v1010_v44 = vpop.xlane.xlu0 %1009 }
 0x26c   : > { %4412 = vpow2.f32 %v1013_v43  ;;  %v1012_v46 = vsub.f32 %v1003_v23, %v1010_v44  ;;  %v471_v23 = vsub.s32 7, %v4676_v32  ;;  %v4795_v30 = vadd.f32 %v788_v22, %v468_v26  ;;  %v874_v43 = vpop.f32.mrb[12].mxu1 }
 0x26d   : > { %v4799_v38 = vadd.f32 %v792_v28, %v468_v26  ;;  %v488_v44 = vrot.slane %v4700_v45, %v4763_v0  ;;  %v4312_v26 = vld [vmem:[%s4620_s19 + $0x30] sm:$0xff]   ;;  %v4314_v28 = vld [vmem:[%s4620_s19 + $0x38] sm:$0xff]  }
 0x26e   : > { %v1015_v47 = vmul.f32 1.442695, %v1012_v46  ;;  %v472_v27 = vrot.slane %v4680_v34, %v471_v23  ;;  %v4309_v46 = vld [vmem:[%s4620_s19 + $0x60] sm:$0xff]  }
 0x26f   : > { %v1122_v48 = vpop.xlane.xlu1 %1121  ;;  %v889_v41 = vpack.c.bf16 %v4799_v38, %v4795_v30  ;;  %3958 = vmatpush3.bf16.msra.mxu0 %v4309_v46 }
 0x270   : > { %4414 = vpow2.f32 %v1015_v47  ;;  %v1126_v49 = vsub.f32 %v1118_v31, %v1122_v48  ;;  %v4797_v31 = vadd.f32 %v790_v25, %v472_v27  ;;  %v876_v47 = vpop.f32.mrb[13].mxu1  ;;  %v4814_v48 = vadd.f32 %v874_v43, %v484_v42  ;;  %3959 = vmatprep.subr.bf16.mxu0 %v4539_v18 }
 0x272   : > { %v1128_v50 = vmul.f32 1.442695, %v1126_v49  ;;  %v4816_v49 = vadd.f32 %v876_v47, %v488_v44 }
 0x273   : > { %v1125_v51 = vpop.xlane.xlu1 %1124 }
 0x274   : > { %4416 = vpow2.f32 %v1128_v50  ;;  %v1127_v52 = vsub.f32 %v1119_v39, %v1125_v51  ;;  %v4801_v39 = vadd.f32 %v794_v29, %v472_v27  ;;  %v878_v50 = vpop.f32.mrb[14].mxu1  ;;  %v4313_v27 = vld [vmem:[%s4620_s19 + $0x70] sm:$0xff]   ;;  %v4315_v29 = vld [vmem:[%s4620_s19 + $0x78] sm:$0xff]  }
 0x275   : > { %v4818_v51 = vadd.f32 %v878_v50, %v484_v42 }
 0x276   : > { %v4743_v53 = vpop.eup %4412  ;;  %v1130_v54 = vmul.f32 1.442695, %v1127_v52  ;;  %v890_v34 = vpack.c.bf16 %v4801_v39, %v4797_v31  ;;  %v880_v52 = vpop.f32.mrb[15].mxu1  ;;  %v4323_v31 = vld [vmem:[%s4620_s19 + $0xb8] sm:$0xff]  }
 0x277   : > { %v1017_v55 = vsel %vm1004_vm4, %v4743_v53, 0.0 }
 0x278   : > { %4418 = vpow2.f32 %v1130_v54  ;;  %1018 = vadd.xlane.f32.xlu0 %v1017_v55  ;;  %v4821_v54 = vadd.f32 %v880_v52, %v488_v44  ;;  %v4311_v55 = vld [vmem:[%s4620_s19 + $0x68] sm:$0xff]  }
 0x279   : > { %3960 = vmatpush3.bf16.msra.mxu0 %v4311_v55 }
 0x27a   : > { %v4747_v56 = vpop.eup %4414  ;;  %v894_v45 = vpack.c.bf16 %v4821_v54, %v4816_v49  ;;  %3961 = vmatprep.subr.bf16.mxu0 %v4539_v18 }
 0x27b   : > { %v1020_v57 = vsel %vm1004_vm4, %v4747_v56, 0.0 }
 0x27c   : > { %1021 = vadd.xlane.f32.xlu1 %v1020_v57  ;;  %v893_v57 = vpack.c.bf16 %v4818_v51, %v4814_v48 }
 0x27d   : > { %3962 = vmatpush3.bf16.msra.mxu0 %v4313_v27 }
 0x27e   : > { %v4751_v58 = vpop.eup %4416  ;;  %3963 = vmatprep.subr.bf16.mxu0 %v4539_v18 }
 0x27f   : > { %v1132_v59 = vsel %vm1004_vm4, %v4751_v58, 0.0 }
 0x280   : > { %1133 = vadd.xlane.f32.xlu0 %v1132_v59 }
 0x281   : > { %3964 = vmatpush3.bf16.msra.mxu0 %v4315_v29  ;;  %v4317_v29 = vld [vmem:[%s4620_s19 + $0x88] sm:$0xff]  }
 0x282   : > { %v4755_v60 = vpop.eup %4418  ;;  %3989 = vmatprep.subr.bf16.mxu0 %v4539_v18 }
 0x283   : > { %v1135_v61 = vsel %vm1004_vm4, %v4755_v60, 0.0 }
 0x284   : > { %1136 = vadd.xlane.f32.xlu1 %v1135_v61 }
 0x305   : > { %v1019_v59 = vpop.xlane.xlu0 %1018 }
 0x306   : > { %4420 = vrcp.f32 %v1019_v59 }
 0x309   : > { %v1022_v61 = vpop.xlane.xlu1 %1021 }
 0x30a   : > { %4422 = vrcp.f32 %v1022_v61 }
 0x30d   : > { %v1134_v63 = vpop.xlane.xlu0 %1133 }
 0x30e   : > { %4424 = vrcp.f32 %v1134_v63 }
 0x310   : > { %v4421_v2 = vpop.eup %4420 }
 0x311   : > { %v1137_v1 = vpop.xlane.xlu1 %1136  ;;  %v1027_v6 = vmul.f32 %v4421_v2, %v4743_v53 }
 0x312   : > { %4426 = vrcp.f32 %v1137_v1 }
 0x314   : > { %v4423_v3 = vpop.eup %4422 }
 0x315   : > { %v1028_v7 = vmul.f32 %v4423_v3, %v4747_v56 }
 0x317   : > { %v1029_v8 = vpack.c.bf16 %v1028_v7, %v1027_v6 }
 0x318   : > { %v4425_v17 = vpop.eup %4424 }
 0x319   : > { %3934 = vmatmul.mubr.msk.bf16.vlgmr.msra.gmra.mrb[16].mxu1 %vm1004_vm4, %v1029_v8  ;;  %v1142_v53 = vmul.f32 %v4425_v17, %v4751_v58  ;;  %v4308_v58 = vld [vmem:[%s4620_s19 + $0x20] sm:$0xff]  }
 0x31a   : > { %3944 = vmatpush3.bf16.msra.mxu1 %v892_v11  ;;  %3945 = vmatprep.mubr.msk.bf16.mxu1 %vm4540_vm2, %v4539_v18  ;;  %v4306_v11 = vld [vmem:[%s4620_s19 + $0x18] sm:$0xff]  }
 0x31b   : > { %3969 = vmatprep.subr.bf16.mxu1 %v4539_v18 }
 0x31c   : > { %v4427_v22 = vpop.eup %4426 }
 0x31d   : > { %v1143_v56 = vmul.f32 %v4427_v22, %v4755_v60  ;;  %v4310_v60 = vld [vmem:[%s4620_s19 + $0x28] sm:$0xff]  }
 0x31f   : > { %v1144_v25 = vpack.c.bf16 %v1143_v56, %v1142_v53 }
 0x321   : > { %3946 = vmatmul.mubr.msk.bf16.vlgmr.msra.gmra.mrb[20].mxu1 %vm1004_vm4, %v1144_v25 }
 0x322   : > { %3970 = vmatpush3.bf16.msra.mxu1 %v4300_v24  ;;  %3985 = vmatprep.mubr.msk.bf16.mxu1 %vm4540_vm2, %v4539_v18 }
 0x323   : > { %3971 = vmatprep.subr.bf16.mxu1 %v4539_v18 }
 0x326   : > { %3972 = vmatpush3.bf16.msra.mxu1 %v4302_v5 }
 0x327   : > { %3973 = vmatprep.subr.bf16.mxu1 %v4539_v18 }
 0x32a   : > { %3974 = vmatpush3.bf16.msra.mxu1 %v4304_v9 }
 0x32b   : > { %3975 = vmatprep.subr.bf16.mxu1 %v4539_v18 }
 0x32e   : > { %3976 = vmatpush3.bf16.msra.mxu1 %v4306_v11 }
 0x32f   : > { %3977 = vmatprep.subr.bf16.mxu1 %v4539_v18 }
 0x332   : > { %3978 = vmatpush3.bf16.msra.mxu1 %v4308_v58 }
 0x333   : > { %3979 = vmatprep.subr.bf16.mxu1 %v4539_v18 }
 0x336   : > { %3980 = vmatpush3.bf16.msra.mxu1 %v4310_v60 }
 0x337   : > { %3981 = vmatprep.subr.bf16.mxu1 %v4539_v18 }
 0x33a   : > { %3982 = vmatpush3.bf16.msra.mxu1 %v4312_v26 }
 0x33b   : > { %3983 = vmatprep.subr.bf16.mxu1 %v4539_v18 }
 0x33e   : > { %3984 = vmatpush3.bf16.msra.mxu1 %v4314_v28  ;;  %v4316_v28 = vld [vmem:[%s4620_s19 + $0x80] sm:$0xff]  }
 0x33f   : > { %3995 = vmatprep.subr.bf16.mxu1 %v4539_v18 }
 0x3ec   : > { %v1067_v40 = vpop.f32.mrb[16].mxu1 }
 0x3ed   : > { %v3935_v42 = vpop.f32.mrb[17].mxu1 }
 0x3ee   : > { %v1070_v43 = vpop.f32.mrb[18].mxu1  ;;  %v4319_v42 = vld [vmem:[%s4620_s19 + $0x98] sm:$0xff]  }
 0x3ef   : > { %v1074_v44 = vpack.c.bf16 %v1070_v43, %v1067_v40  ;;  %v3936_v46 = vpop.f32.mrb[19].mxu1  ;;  %v4318_v40 = vld [vmem:[%s4620_s19 + $0x90] sm:$0xff]   ;;  %v4320_v43 = vld [vmem:[%s4620_s19 + $0xa0] sm:$0xff]  }
 0x3f0   : > { %v4322_v46 = vld [vmem:[%s4620_s19 + $0xb0] sm:$0xff]  }
 0x3f1   : > { %3986 = vmatmul.mubr.bf16.vlgmr.msra.gmra.mrb[24].mxu1 %v1074_v44  ;;  %v4321_v44 = vld [vmem:[%s4620_s19 + $0xa8] sm:$0xff]  }
 0x3f2   : > { %3996 = vmatpush3.bf16.msra.mxu1 %v893_v57  ;;  %3997 = vmatprep.mubr.msk.bf16.mxu1 %vm4540_vm2, %v4539_v18 }
 0x3f3   : > { %4021 = vmatprep.subr.bf16.mxu1 %v4539_v18 }
 0x3f4   : > { %v1182_v47 = vpop.f32.mrb[20].mxu1 }
 0x3f5   : > { %v3947_v50 = vpop.f32.mrb[21].mxu1 }
 0x3f6   : > { %v1185_v52 = vpop.f32.mrb[22].mxu1 }
 0x3f7   : > { %v1189_v55 = vpack.c.bf16 %v1185_v52, %v1182_v47  ;;  %v3948_v59 = vpop.f32.mrb[23].mxu1 }
 0x3f9   : > { %3966 = vmatmul.mubr.bf16.vlgmr.msra.gmra.mrb[16].mxu0 %v1189_v55 }
 0x3fa   : > { %3990 = vmatpush3.bf16.xpose.msra.mxu0 %v889_v41  ;;  %3991 = vmatprep.mubr.msk.bf16.mxu0 %vm4540_vm2, %v4539_v18 }
 0x3fb   : > { %4001 = vmatprep.subr.bf16.mxu0 %v4539_v18 }
 0x401   : > { %3992 = vmatmul.mubr.bf16.vlgmr.msra.gmra.mrb[20].mxu0 %v885_v19 }
 0x402   : > { %4017 = vmatprep.mubr.msk.bf16.mxu0 %vm4540_vm2, %v4539_v18  ;;  %4002 = vmatpush3.bf16.msra.mxu0 %v4316_v28 }
 0x403   : > { %4003 = vmatprep.subr.bf16.mxu0 %v4539_v18 }
 0x406   : > { %4004 = vmatpush3.bf16.msra.mxu0 %v4317_v29  ;;  %v4324_v29 = vld [vmem:[%s4620_s19 + $0xc0] sm:$0xff]  }
 0x407   : > { %4005 = vmatprep.subr.bf16.mxu0 %v4539_v18 }
 0x40a   : > { %4006 = vmatpush3.bf16.msra.mxu0 %v4318_v40 }
 0x40b   : > { %4007 = vmatprep.subr.bf16.mxu0 %v4539_v18 }
 0x40e   : > { %4008 = vmatpush3.bf16.msra.mxu0 %v4319_v42  ;;  %v4327_v42 = vld [vmem:[%s4620_s19 + $0xd8] sm:$0xff]  }
 0x40f   : > { %4009 = vmatprep.subr.bf16.mxu0 %v4539_v18 }
 0x412   : > { %4010 = vmatpush3.bf16.msra.mxu0 %v4320_v43  ;;  %v4328_v43 = vld [vmem:[%s4620_s19 + $0xe0] sm:$0xff]  }
 0x413   : > { %4011 = vmatprep.subr.bf16.mxu0 %v4539_v18 }
 0x416   : > { %4012 = vmatpush3.bf16.msra.mxu0 %v4321_v44  ;;  %v4329_v44 = vld [vmem:[%s4620_s19 + $0xe8] sm:$0xff]  }
 0x417   : > { %4013 = vmatprep.subr.bf16.mxu0 %v4539_v18 }
 0x41a   : > { %4014 = vmatpush3.bf16.msra.mxu0 %v4322_v46  ;;  %v4330_v46 = vld [vmem:[%s4620_s19 + $0xf0] sm:$0xff]  }
 0x41b   : > { %4015 = vmatprep.subr.bf16.mxu0 %v4539_v18 }
 0x41e   : > { %4016 = vmatpush3.bf16.msra.mxu0 %v4323_v31  ;;  %v4332_v31 = vld [vmem:[%s4615_s15 + $0x30] ss:$100 sps:$4 sm:$0xff]  }
 0x4c4   : > { %v1361_v48 = vpop.f32.mrb[24].mxu1 }
 0x4c5   : > { %v3987_v51 = vpop.f32.mrb[25].mxu1 }
 0x4c6   : > { %v1364_v57 = vpop.f32.mrb[26].mxu1 }
 0x4c7   : > { %v3988_v61 = vpop.f32.mrb[27].mxu1 }
 0x4cc   : > { %v1272_v63 = vpop.f32.mrb[16].mxu0 }
 0x4cd   : > { %v4880_v1 = vadd.f32 %v1361_v48, %v1272_v63  ;;  %v3967_v30 = vpop.f32.mrb[17].mxu0 }
 0x4ce   : > { %v1275_v38 = vpop.f32.mrb[18].mxu0 }
 0x4cf   : > { %v4882_v41 = vadd.f32 %v1364_v57, %v1275_v38  ;;  %v3968_v2 = vpop.f32.mrb[19].mxu0 }
 0x4d4   : > { %v1402_v3 = vpop.f32.mrb[20].mxu0 }
 0x4d5   : > { %v1409_v6 = vmul.f32 0.35355338, %v1402_v3  ;;  %v3993_v7 = vpop.f32.mrb[21].mxu0 }
 0x4d6   : > { %v1405_v10 = vpop.f32.mrb[22].mxu0 }
 0x4d7   : > { %v1410_v15 = vmul.f32 0.35355338, %v1405_v10  ;;  %v3994_v19 = vpop.f32.mrb[23].mxu0  ;;  %v1411_v8 = vsel %vm406_vm3, -1e+09, %v1409_v6 }
 0x4d8   : > { %v1413_v17 = vsel %vm1004_vm4, %v1411_v8, -inf }
 0x4d9   : > { %1414 = vmax.xlane.f32.xlu0 %v1413_v17  ;;  %v1412_v22 = vsel %vm407_vm5, -1e+09, %v1410_v15 }
 0x4da   : > { %v1416_v53 = vsel %vm1004_vm4, %v1412_v22, -inf }
 0x4db   : > { %1417 = vmax.xlane.f32.xlu1 %v1416_v53 }
 0x566   : > { %v1415_v56 = vpop.xlane.xlu0 %1414 }
 0x567   : > { %v1419_v24 = vsub.f32 %v1411_v8, %v1415_v56 }
 0x568   : > { %v1418_v25 = vpop.xlane.xlu1 %1417 }
 0x569   : > { %v1421_v5 = vmul.f32 1.442695, %v1419_v24  ;;  %v1420_v9 = vsub.f32 %v1412_v22, %v1418_v25 }
 0x56b   : > { %4428 = vpow2.f32 %v1421_v5  ;;  %v1423_v11 = vmul.f32 1.442695, %v1420_v9 }
 0x56d   : > { %4430 = vpow2.f32 %v1423_v11 }
 0x575   : > { %v4429_v58 = vpop.eup %4428 }
 0x576   : > { %v1425_v60 = vsel %vm1004_vm4, %v4429_v58, 0.0 }
 0x577   : > { %v4431_v26 = vpop.eup %4430  ;;  %1426 = vadd.xlane.f32.xlu0 %v1425_v60 }
 0x578   : > { %v1428_v27 = vsel %vm1004_vm4, %v4431_v26, 0.0 }
 0x579   : > { %1429 = vadd.xlane.f32.xlu1 %v1428_v27 }
 0x604   : > { %v1427_v47 = vpop.xlane.xlu0 %1426 }
 0x605   : > { %4432 = vrcp.f32 %v1427_v47  ;;  %v4331_v47 = vld [vmem:[%s4620_s19 + $0xf8] sm:$0xff]  }
 0x606   : > { %v1430_v50 = vpop.xlane.xlu1 %1429 }
 0x607   : > { %4434 = vrcp.f32 %v1430_v50 }
 0x60f   : > { %v4433_v52 = vpop.eup %4432 }
 0x610   : > { %v1435_v59 = vmul.f32 %v4433_v52, %v4429_v58 }
 0x611   : > { %v4435_v55 = vpop.eup %4434 }
 0x612   : > { %v1436_v48 = vmul.f32 %v4435_v55, %v4431_v26 }
 0x614   : > { %v1437_v51 = vpack.c.bf16 %v1436_v48, %v1435_v59 }
 0x616   : > { %3998 = vmatmul.mubr.msk.bf16.vlgmr.msra.gmra.mrb[28].mxu1 %vm1004_vm4, %v1437_v51  ;;  %v4334_v51 = vld [vmem:[%s4615_s15 + $0x34] ss:$100 sps:$4 sm:$0xff]  }
 0x617   : > { %4022 = vmatpush3.bf16.xpose.msra.mxu1 %v890_v34  ;;  %4023 = vmatprep.mubr.msk.bf16.mxu1 %vm4540_vm2, %v4539_v18 }
 0x618   : > { %4027 = vmatprep.subr.bf16.mxu1 %v4539_v18  ;;  %1863 = vmatprep.subr.bf16.mxu0 %v4334_v51 }
 0x61e   : > { %4024 = vmatmul.mubr.bf16.vlgmr.msra.gmra.mrb[32].mxu1 %v886_v20 }
 0x61f   : > { %4028 = vmatpush3.bf16.msra.mxu1 %v894_v45  ;;  %4029 = vmatprep.mubr.msk.bf16.mxu1 %vm4540_vm2, %v4539_v18 }
 0x620   : > { %4033 = vmatprep.subr.bf16.mxu1 %v4539_v18 }
 0x6e9   : > { %v1475_v39 = vpop.f32.mrb[28].mxu1 }
 0x6ea   : > { %v3999_v34 = vpop.f32.mrb[29].mxu1 }
 0x6eb   : > { %v1478_v57 = vpop.f32.mrb[30].mxu1  ;;  %v4335_v34 = vld [vmem:[%s4615_s15 + $0xf8] ss:$100 sps:$4 sm:$0xff]  }
 0x6ec   : > { %v1482_v61 = vpack.c.bf16 %v1478_v57, %v1475_v39  ;;  %v4000_v63 = vpop.f32.mrb[31].mxu1  ;;  %v4337_v39 = vld [vmem:[%s4615_s15 + $0xfc] ss:$100 sps:$4 sm:$0xff]  }
 0x6ed   : > { %v4340_v57 = vld [vmem:[%s4615_s15 + $0x3c] ss:$100 sps:$4 sm:$0xff]  }
 0x6ee   : > { %4018 = vmatmul.mubr.bf16.vlgmr.msra.gmra.mrb[24].mxu0 %v1482_v61 }
 0x6ef   : > { %1895 = vmatprep.mubr.bf16.mxu0 %v4538_v4  ;;  %1864 = vmatpush1.bf16.msra.mxu0 %v4332_v31 }
 0x6f0   : > { %1865 = vmatprep.subr.bf16.mxu0 %v4337_v39 }
 0x6f1   : > { %v1608_v14 = vpop.f32.mrb[32].mxu1 }
 0x6f2   : > { %v1615_v16 = vmul.f32 0.35355338, %v1608_v14  ;;  %v4025_v20 = vpop.f32.mrb[33].mxu1 }
 0x6f3   : > { %v1611_v49 = vpop.f32.mrb[34].mxu1  ;;  %1866 = vmatpush1.bf16.msra.mxu0 %v4335_v34 }
 0x6f4   : > { %v1616_v54 = vmul.f32 0.35355338, %v1611_v49  ;;  %v4026_v45 = vpop.f32.mrb[35].mxu1  ;;  %v1617_v30 = vsel %vm406_vm3, -1e+09, %v1615_v16  ;;  %1906 = vmatprep.subr.bf16.mxu0 %v4340_v57 }
 0x6f5   : > { %v1619_v38 = vsel %vm1004_vm4, %v1617_v30, -inf  ;;  %v3705_v16 = vld [vmem:[%s4625_s22 + $0x19] ss:$0 sm:$0xff] }
 0x6f6   : > { %1620 = vmax.xlane.f32.xlu0 %v1619_v38  ;;  %v1618_v2 = vsel %vm407_vm5, -1e+09, %v1616_v54  ;;  %v4338_v38 = vld [vmem:[%s4615_s15 + $0x38] ss:$100 sps:$4 sm:$0xff]  }
 0x6f7   : > { %v1622_v3 = vsel %vm1004_vm4, %v1618_v2, -inf }
 0x6f8   : > { %1623 = vmax.xlane.f32.xlu1 %v1622_v3  ;;  %v4343_v3 = vld [vmem:[%s4615_s15 + $0x104] ss:$100 sps:$4 sm:$0xff]  }
 0x783   : > { %v1621_v6 = vpop.xlane.xlu0 %1620 }
 0x784   : > { %v1625_v7 = vsub.f32 %v1617_v30, %v1621_v6  ;;  %v4341_v6 = vld [vmem:[%s4615_s15 + $0x100] ss:$100 sps:$4 sm:$0xff]  }
 0x785   : > { %v1624_v10 = vpop.xlane.xlu1 %1623 }
 0x786   : > { %v1627_v15 = vmul.f32 1.442695, %v1625_v7  ;;  %v1626_v19 = vsub.f32 %v1618_v2, %v1624_v10  ;;  %v4346_v7 = vld [vmem:[%s4615_s15 + $0x44] ss:$100 sps:$4 sm:$0xff]  }
 0x787   : > { %v4344_v10 = vld [vmem:[%s4615_s15 + $0x40] ss:$100 sps:$4 sm:$0xff]  }
 0x788   : > { %4436 = vpow2.f32 %v1627_v15  ;;  %v1629_v8 = vmul.f32 1.442695, %v1626_v19  ;;  %v4349_v15 = vld [vmem:[%s4615_s15 + $0x10c] ss:$100 sps:$4 sm:$0xff]  }
 0x789   : > { %v4347_v19 = vld [vmem:[%s4615_s15 + $0x108] ss:$100 sps:$4 sm:$0xff]  }
 0x78a   : > { %4438 = vpow2.f32 %v1629_v8  ;;  %v4350_v8 = vld [vmem:[%s5398_s1] sm:$0xff]  }
 0x792   : > { %v4437_v17 = vpop.eup %4436 }
 0x793   : > { %v1631_v12 = vsel %vm1004_vm4, %v4437_v17, 0.0 }
 0x794   : > { %v4439_v22 = vpop.eup %4438  ;;  %1632 = vadd.xlane.f32.xlu0 %v1631_v12  ;;  %v4352_v12 = vld [vmem:[%s4615_s15 + $0x50] ss:$100 sps:$4 sm:$0xff]  }
 0x795   : > { %v1634_v53 = vsel %vm1004_vm4, %v4439_v22, 0.0 }
 0x796   : > { %1635 = vadd.xlane.f32.xlu1 %v1634_v53  ;;  %v4357_v53 = vld [vmem:[%s4615_s15 + $0x11c] ss:$100 sps:$4 sm:$0xff]  }
 0x7c1   : > { %v1565_v13 = vpop.f32.mrb[24].mxu0 }
 0x7c2   : > { %v1572_v56 = vadd.f32 %v1565_v13, %v4880_v1  ;;  %v4019_v24 = vpop.f32.mrb[25].mxu0  ;;  %v4325_v1 = vld [vmem:[%s4620_s19 + $0xc8] sm:$0xff]   ;;  %v4355_v13 = vld [vmem:[%s4615_s15 + $0x118] ss:$100 sps:$4 sm:$0xff]  }
 0x7c3   : > { %v1568_v25 = vpop.f32.mrb[26].mxu0  ;;  %v4360_v24 = vld [vmem:[%s4615_s15 + $0x4c] ss:$100 sps:$4 sm:$0xff]  }
 0x7c4   : > { %v1573_v5 = vadd.f32 %v1568_v25, %v4882_v41  ;;  %v4020_v9 = vpop.f32.mrb[27].mxu0  ;;  %v4326_v41 = vld [vmem:[%s4620_s19 + $0xd0] sm:$0xff]  }
 0x7c5   : > { %v4363_v25 = vld [vmem:[%s4615_s15 + $0x114] ss:$100 sps:$4 sm:$0xff]   ;;  %v4366_v9 = vld [vmem:[%s4615_s15 + $0x5c] ss:$100 sps:$4 sm:$0xff]  }
 0x821   : > { %v1633_v11 = vpop.xlane.xlu0 %1632 }
 0x822   : > { %4440 = vrcp.f32 %v1633_v11  ;;  %v4364_v11 = vld [vmem:[%s4615_s15 + $0x58] ss:$100 sps:$4 sm:$0xff]  }
 0x823   : > { %v1636_v58 = vpop.xlane.xlu1 %1635 }
 0x824   : > { %4442 = vrcp.f32 %v1636_v58  ;;  %v4367_v58 = vld [vmem:[%s4615_s15 + $0x120] ss:$100 sps:$4 sm:$0xff]  }
 0x82c   : > { %v4441_v60 = vpop.eup %4440 }
 0x82d   : > { %v1641_v27 = vmul.f32 %v4441_v60, %v4437_v17  ;;  %v4351_v17 = vld [vmem:[%s5398_s1 + $0x8] ss:$0 sps:$4 sm:$0xff]  }
 0x82e   : > { %v4443_v26 = vpop.eup %4442  ;;  %v4369_v60 = vld [vmem:[%s4615_s15 + $0x124] ss:$100 sps:$4 sm:$0xff]  }
 0x82f   : > { %v1642_v28 = vmul.f32 %v4443_v26, %v4439_v22  ;;  %v4354_v22 = vld [vmem:[%s4615_s15 + $0x54] ss:$100 sps:$4 sm:$0xff]   ;;  %v1798_v26 = vld [vmem:[%s4625_s22 + $0xc] sm:$0xf] }
 0x831   : > { %v1643_v40 = vpack.c.bf16 %v1642_v28, %v1641_v27  ;;  %v1803_v27 = vrot.slane %v1798_v26, %v4684_v36 }
 0x833   : > { %4030 = vmatmul.mubr.msk.bf16.vlgmr.msra.gmra.mrb[36].mxu1 %vm1004_vm4, %v1643_v40 }
 0x834   : > { %4034 = vmatpush3.bf16.msra.mxu1 %v4324_v29  ;;  %4049 = vmatprep.mubr.msk.bf16.mxu1 %vm4540_vm2, %v4539_v18  ;;  %v1807_v29 = vrot.slane %v1798_v26, %v4687_v37 }
 0x835   : > { %4035 = vmatprep.subr.bf16.mxu1 %v4539_v18 }
 0x838   : > { %4036 = vmatpush3.bf16.msra.mxu1 %v4325_v1 }
 0x839   : > { %4037 = vmatprep.subr.bf16.mxu1 %v4539_v18 }
 0x83c   : > { %4038 = vmatpush3.bf16.msra.mxu1 %v4326_v41 }
 0x83d   : > { %4039 = vmatprep.subr.bf16.mxu1 %v4539_v18 }
 0x840   : > { %4040 = vmatpush3.bf16.msra.mxu1 %v4327_v42 }
 0x841   : > { %4041 = vmatprep.subr.bf16.mxu1 %v4539_v18 }
 0x844   : > { %4042 = vmatpush3.bf16.msra.mxu1 %v4328_v43 }
 0x845   : > { %4043 = vmatprep.subr.bf16.mxu1 %v4539_v18 }
 0x848   : > { %4044 = vmatpush3.bf16.msra.mxu1 %v4329_v44 }
 0x849   : > { %4045 = vmatprep.subr.bf16.mxu1 %v4539_v18 }
 0x84c   : > { %4046 = vmatpush3.bf16.msra.mxu1 %v4330_v46 }
 0x84d   : > { %4047 = vmatprep.subr.bf16.mxu1 %v4539_v18 }
 0x850   : > { %4048 = vmatpush3.bf16.msra.mxu1 %v4331_v47 }
 0x851   : > { %2156 = vmatprep.subr.bf16.mxu1 %v4360_v24 }
 0x906   : > { %v1681_v50 = vpop.f32.mrb[36].mxu1 }
 0x907   : > { %v4031_v52 = vpop.f32.mrb[37].mxu1 }
 0x908   : > { %v1684_v55 = vpop.f32.mrb[38].mxu1 }
 0x909   : > { %v1688_v59 = vpack.c.bf16 %v1684_v55, %v1681_v50  ;;  %v4032_v48 = vpop.f32.mrb[39].mxu1  ;;  %v1811_v50 = vrot.slane %v1798_v26, %v4760_v62  ;;  %v1815_v55 = vrot.slane %v1798_v26, %v4763_v0 }
 0x90b   : > { %4050 = vmatmul.mubr.bf16.vlgmr.msra.gmra.mrb[40].mxu1 %v1688_v59 }
 0x90c   : > { %2188 = vmatprep.mubr.bf16.mxu1 %v4538_v4 }
 0x9de   : > { %v1771_v61 = vpop.f32.mrb[40].mxu1 }
 0x9df   : > { %v1778_v63 = vadd.f32 %v1771_v61, %v1572_v56  ;;  %v4051_v14 = vpop.f32.mrb[41].mxu1  ;;  %v4358_v56 = vld [vmem:[%s4615_s15 + $0x48] ss:$100 sps:$4 sm:$0xff]   ;;  %v5022_v61 = vld [vmem:[%s4625_s22 + $0x10] sm:$0xff] }
 0x9e0   : > { %v1774_v20 = vpop.f32.mrb[42].mxu1  ;;  %2157 = vmatpush1.bf16.msra.mxu1 %v4358_v56 }
 0x9e1   : > { %v1779_v49 = vadd.f32 %v1774_v20, %v1573_v5  ;;  %v4052_v54 = vpop.f32.mrb[43].mxu1  ;;  %v1787_v45 = vadd.f32 %v3705_v16, %v1778_v63  ;;  %v4361_v5 = vld [vmem:[%s4615_s15 + $0x110] ss:$100 sps:$4 sm:$0xff]   ;;  %2158 = vmatprep.subr.bf16.mxu1 %v4363_v25 }
 0x9e3   : > { %v1788_v30 = vadd.f32 %v3705_v16, %v1779_v49  ;;  %v1974_v16 = vrot.slane %v5022_v61, %v4684_v36  ;;  %v1978_v49 = vrot.slane %v5022_v61, %v4687_v37 }
 0x9e4   : > { %2159 = vmatpush1.bf16.msra.mxu1 %v4361_v5 }
 0x9e5   : > { %v1789_v2 = vpack.c.bf16 %v1788_v30, %v1787_v45  ;;  %2258 = vmatprep.subr.bf16.mxu1 %v4366_v9 }
 0x9e7   : > { %3714 = vmatmul.mubr.msk.bf16.vlgmr.msra.gmra.mrb[28].mxu0 %vm621_vm1, %v1789_v2  ;;  %3736 = vmatmul.mubr.msk.bf16.vlgmr.msra.gmra.mrb[44].mxu1 %vm621_vm1, %v4350_v8 }
 0x9e8   : > { %1907 = vmatpush1.bf16.msra.mxu0 %v4338_v38  ;;  %1938 = vmatprep.mubr.bf16.mxu0 %v4538_v4 }
 0x9e9   : > { %1908 = vmatprep.subr.bf16.mxu0 %v4343_v3  ;;  %2198 = vmatprep.mubr.bf16.mxu1 %v4538_v4 }
 0x9ea   : > { %2259 = vmatpush1.bf16.msra.mxu1 %v4364_v11 }
 0x9eb   : > { %2260 = vmatprep.subr.bf16.mxu1 %v4369_v60 }
 0x9ec   : > { %1909 = vmatpush1.bf16.msra.mxu0 %v4341_v6 }
 0x9ed   : > { %2105 = vmatprep.subr.bf16.mxu0 %v4346_v7 }
 0x9ee   : > { %2261 = vmatpush1.bf16.msra.mxu1 %v4367_v58 }
 0x9ef   : > { %3715 = vmatmul.mubr.msk.bf16.vlgmr.msra.gmra.mrb[32].mxu0 %vm621_vm1, %v1789_v2  ;;  %3737 = vmatmul.mubr.msk.bf16.gmra.mrb[48].mxu1 %vm621_vm1, %v4351_v17 }
 0x9f0   : > { %2106 = vmatpush1.bf16.msra.mxu0 %v4344_v10  ;;  %2137 = vmatprep.mubr.bf16.mxu0 %v4538_v4 }
 0x9f1   : > { %2107 = vmatprep.subr.bf16.mxu0 %v4349_v15  ;;  %2290 = vmatprep.mubr.bf16.mxu1 %v4538_v4 }
 0x9f2   : > { %4061 = vmatprep.subr.bf16.mxu1 %v4539_v18 }
 0x9f4   : > { %2108 = vmatpush1.bf16.msra.mxu0 %v4347_v19 }
 0x9f5   : > { %2207 = vmatprep.subr.bf16.mxu0 %v4354_v22 }
 0x9f7   : > { %3734 = vmatmul.mubr.msk.bf16.vlgmr.msra.gmra.mrb[36].mxu0 %vm621_vm1, %v4350_v8  ;;  %3740 = vmatmul.mubr.msk.bf16.vlgmr.msra.gmra.mrb[52].mxu1 %vm621_vm1, %v4350_v8 }
 0x9f8   : > { %2147 = vmatprep.mubr.bf16.mxu0 %v4538_v4  ;;  %2208 = vmatpush1.bf16.msra.mxu0 %v4352_v12 }
 0x9f9   : > { %2209 = vmatprep.subr.bf16.mxu0 %v4357_v53  ;;  %2300 = vmatprep.mubr.bf16.mxu1 %v4538_v4  ;;  %v1990_v53 = vrot.slane %v5022_v61, %v459_v33 }
 0x9fc   : > { %2210 = vmatpush1.bf16.msra.mxu0 %v4355_v13  ;;  %v5046_v13 = vrot.slane %v5022_v61, %v463_v35 }
 0x9fd   : > { %4053 = vmatprep.subr.bf16.mxu0 %v4539_v18 }
 0x9ff   : > { %3735 = vmatmul.mubr.msk.bf16.gmra.mrb[40].mxu0 %vm621_vm1, %v4351_v17  ;;  %3741 = vmatmul.mubr.msk.bf16.gmra.mrb[56].mxu1 %vm621_vm1, %v4351_v17 }
 0xa00   : > { %2239 = vmatprep.mubr.bf16.mxu0 %v4538_v4  ;;  %4065 = vmatprep.mubr.msk.bf16.mxu1 %vm4540_vm2, %v4539_v18 }
 0xa07   : > { %3738 = vmatmul.mubr.msk.bf16.vlgmr.msra.gmra.mrb[44].mxu0 %vm621_vm1, %v4350_v8 }
 0xa08   : > { %2249 = vmatprep.mubr.bf16.mxu0 %v4538_v4 }
 0xa0f   : > { %3739 = vmatmul.mubr.msk.bf16.gmra.mrb[48].mxu0 %vm621_vm1, %v4351_v17 }
 0xa10   : > { %4057 = vmatprep.mubr.msk.bf16.mxu0 %vm4540_vm2, %v4539_v18 }
 0xaba   : > { %v1897_v28 = vpop.f32.mrb[28].mxu0 }
 0xabb   : > { %v1899_v40 = vpop.f32.mrb[29].mxu0  ;;  %v1898_v41 = vadd.f32 %v1897_v28, %v1803_v27 }
 0xabc   : > { %v1901_v1 = vpop.f32.mrb[30].mxu0  ;;  %v1900_v44 = vadd.f32 %v1899_v40, %v1807_v29 }
 0xabd   : > { %v1902_v42 = vadd.f32 %v1901_v1, %v1803_v27  ;;  %v1903_v43 = vpop.f32.mrb[31].mxu0 }
 0xabe   : > { %v1904_v46 = vadd.f32 %v1903_v43, %v1807_v29  ;;  %v5069_v43 = vld [vmem:[%s5400_s3 + $0x8] sm:$0xff] }
 0xabf   : > { %v1949_v4 = vpack.c.bf16 %v1902_v42, %v1898_v41  ;;  %v5064_v42 = vld [vmem:[%s5400_s3] sm:$0xff]  ;;  %vm411_vm9 = vcmp.eq.f32.partialorder %v5069_v43, 0.0 }
 0xac0   : > { %v1950_v47 = vpack.c.bf16 %v1904_v46, %v1900_v44  ;;  %vm410_vm7 = vcmp.eq.f32.partialorder %v5064_v42, 0.0 }
 0xac2   : > { %v1940_v52 = vpop.f32.mrb[32].mxu0 }
 0xac3   : > { %v1942_v59 = vpop.f32.mrb[33].mxu0  ;;  %v5013_v51 = vadd.f32 %v1940_v52, %v1811_v50 }
 0xac4   : > { %v1944_v48 = vpop.f32.mrb[34].mxu0  ;;  %v5017_v34 = vadd.f32 %v1942_v59, %v1815_v55 }
 0xac5   : > { %v5015_v31 = vadd.f32 %v1944_v48, %v1811_v50  ;;  %v1946_v39 = vpop.f32.mrb[35].mxu0 }
 0xac6   : > { %v5019_v57 = vadd.f32 %v1946_v39, %v1815_v55 }
 0xac7   : > { %v1951_v63 = vpack.c.bf16 %v5015_v31, %v5013_v51 }
 0xac8   : > { %v1952_v14 = vpack.c.bf16 %v5019_v57, %v5017_v34 }
 0xaca   : > { %v2139_v20 = vpop.f32.mrb[36].mxu0 }
 0xacb   : > { %v2141_v54 = vpop.f32.mrb[37].mxu0  ;;  %v2140_v30 = vadd.f32 %v2139_v20, %v1974_v16 }
 0xacc   : > { %v2143_v45 = vpop.f32.mrb[38].mxu0  ;;  %v2142_v3 = vadd.f32 %v2141_v54, %v1978_v49 }
 0xacd   : > { %v2144_v38 = vadd.f32 %v2143_v45, %v1974_v16  ;;  %v2145_v2 = vpop.f32.mrb[39].mxu0 }
 0xace   : > { %v2146_v6 = vadd.f32 %v2145_v2, %v1978_v49 }
 0xacf   : > { %v2309_v7 = vpack.c.bf16 %v2144_v38, %v2140_v30 }
 0xad0   : > { %v2310_v10 = vpack.c.bf16 %v2146_v6, %v2142_v3 }
 0xad1   : > { %4054 = vmatpush3.bf16.xpose.msra.mxu0 %v2309_v7 }
 0xad2   : > { %v2149_v15 = vpop.f32.mrb[40].mxu0  ;;  %4055 = vmatprep.subr.bf16.mxu0 %v4539_v18 }
 0xad3   : > { %v2150_v19 = vadd.f32 %v2149_v15, %v1974_v16  ;;  %v2151_v8 = vpop.f32.mrb[41].mxu0 }
 0xad4   : > { %v2153_v36 = vpop.f32.mrb[42].mxu0  ;;  %v2152_v37 = vadd.f32 %v2151_v8, %v1978_v49 }
 0xad5   : > { %v2317_v17 = vpack.c.bf16 %v2150_v19, %v2150_v19  ;;  %v2154_v12 = vpop.f32.mrb[43].mxu0 }
 0xad6   : > { %v2318_v22 = vpack.c.bf16 %v2152_v37, %v2152_v37 }
 0xad9   : > { %4056 = vmatpush3.bf16.xpose.msra.mxu0 %v2317_v17 }
 0xada   : > { %4069 = vmatprep.subr.bf16.mxu0 %v4539_v18  ;;  %v2241_v56 = vpop.f32.mrb[44].mxu0 }
 0xadb   : > { %v2242_v24 = vadd.f32 %v2241_v56, %v1990_v53  ;;  %v2243_v25 = vpop.f32.mrb[45].mxu0 }
 0xadc   : > { %v5049_v5 = vadd.f32 %v2243_v25, %v5046_v13  ;;  %v2245_v9 = vpop.f32.mrb[46].mxu0 }
 0xadd   : > { %v2246_v11 = vadd.f32 %v2245_v9, %v1990_v53  ;;  %v2247_v58 = vpop.f32.mrb[47].mxu0 }
 0xade   : > { %v5052_v60 = vadd.f32 %v2247_v58, %v5046_v13 }
 0xadf   : > { %v2313_v26 = vpack.c.bf16 %v2246_v11, %v2242_v24 }
 0xae0   : > { %4058 = vmatmul.mubr.bf16.vlgmr.msra.gmra.mrb[52].mxu0 %v1949_v4  ;;  %v2314_v33 = vpack.c.bf16 %v5052_v60, %v5049_v5  ;;  %v4373_v60 = vld [vmem:[%s4620_s19 + $0x140] sm:$0xff]  }
 0xae1   : > { %4070 = vmatpush3.bf16.xpose.msra.mxu0 %v2310_v10  ;;  %4073 = vmatprep.mubr.msk.bf16.mxu0 %vm4540_vm2, %v4539_v18 }
 0xae2   : > { %4071 = vmatprep.subr.bf16.mxu0 %v4539_v18  ;;  %4062 = vmatpush3.bf16.msra.mxu1 %v2313_v26  ;;  %v2251_v27 = vpop.f32.mrb[48].mxu0 }
 0xae3   : > { %4063 = vmatprep.subr.bf16.mxu1 %v4539_v18  ;;  %v2252_v35 = vadd.f32 %v2251_v27, %v1990_v53  ;;  %v5057_v28 = vpop.f32.mrb[49].mxu0 }
 0xae4   : > { %v2255_v29 = vpop.f32.mrb[50].mxu0 }
 0xae5   : > { %v2321_v40 = vpack.c.bf16 %v2252_v35, %v2252_v35  ;;  %v2256_v1 = vpop.f32.mrb[51].mxu0  ;;  %v4370_v29 = vld [vmem:[%s4620_s19 + $0x100] sm:$0xff]  }
 0xae6   : > { %v2190_v1 = vpop.f32.mrb[44].mxu1 }
 0xae7   : > { %v2465_v41 = vsel %vm2463_vm6, %v2321_v40, 0  ;;  %v5104_v40 = vrot.slane %v5022_v61, %v4760_v62 }
 0xae8   : > { %4064 = vmatpush3.bf16.msra.mxu1 %v2465_v41  ;;  %v5108_v41 = vrot.slane %v5022_v61, %v4763_v0 }
 0xae9   : > { %4072 = vmatpush3.bf16.xpose.msra.mxu0 %v2318_v22  ;;  %4077 = vmatprep.subr.bf16.mxu1 %v4539_v18 }
 0xaea   : > { %4105 = vmatprep.subr.bf16.mxu0 %v4539_v18 }
 0xaf0   : > { %4074 = vmatmul.mubr.bf16.vlgmr.msra.gmra.mrb[56].mxu0 %v1950_v47 }
 0xaf1   : > { %4121 = vmatprep.mubr.msk.bf16.mxu0 %vm4540_vm2, %v4539_v18  ;;  %4106 = vmatpush3.bf16.msra.mxu0 %v4370_v29 }
 0xaf2   : > { %4107 = vmatprep.subr.bf16.mxu0 %v4539_v18 }
 0xbb3   : > { %v2423_v44 = vpop.f32.mrb[52].mxu0 }
 0xbb4   : > { %v2430_v46 = vmul.f32 0.35355338, %v2423_v44  ;;  %v4059_v4 = vpop.f32.mrb[53].mxu0  ;;  %v2192_v44 = vpop.f32.mrb[45].mxu1 }
 0xbb5   : > { %v2426_v47 = vpop.f32.mrb[54].mxu0  ;;  %v5114_v4 = vadd.f32 %v2192_v44, %v5108_v41 }
 0xbb6   : > { %v2431_v50 = vmul.f32 0.35355338, %v2426_v47  ;;  %v4060_v52 = vpop.f32.mrb[55].mxu0  ;;  %v2432_v55 = vsel %vm410_vm7, -1e+09, %v2430_v46  ;;  %v5111_v46 = vadd.f32 %v2190_v1, %v5104_v40  ;;  %v2194_v47 = vpop.f32.mrb[46].mxu1 }
 0xbb7   : > { %v2435_v59 = vsel %vm2434_vm8, %v2432_v55, -inf  ;;  %v5118_v52 = vadd.f32 %v2194_v47, %v5104_v40  ;;  %v2196_v62 = vpop.f32.mrb[47].mxu1 }
 0xbb8   : > { %2436 = vmax.xlane.f32.xlu0 %v2435_v59  ;;  %v2433_v48 = vsel %vm411_vm9, -1e+09, %v2431_v50  ;;  %v4371_v50 = vld [vmem:[%s4620_s19 + $0x108] sm:$0xff]   ;;  %v5122_v0 = vadd.f32 %v2196_v62, %v5108_v41  ;;  %v4377_v62 = vld [vmem:[%s4620_s19 + $0x150] sm:$0xff]  }
 0xbb9   : > { %v2438_v39 = vsel %vm2434_vm8, %v2433_v48, -inf  ;;  %v2311_v59 = vpack.c.bf16 %v5118_v52, %v5111_v46  ;;  %4108 = vmatpush3.bf16.msra.mxu0 %v4371_v50  ;;  %v4375_v50 = vld [vmem:[%s4620_s19 + $0x148] sm:$0xff]  }
 0xbba   : > { %2439 = vmax.xlane.f32.xlu1 %v2438_v39  ;;  %v5133_v39 = vrot.slane %v5022_v61, %v467_v21  ;;  %4109 = vmatprep.subr.bf16.mxu0 %v4539_v18 }
 0xbc3   : > { %v2543_v16 = vpop.f32.mrb[56].mxu0 }
 0xbc4   : > { %v2550_v20 = vmul.f32 0.35355338, %v2543_v16  ;;  %v4075_v49 = vpop.f32.mrb[57].mxu0  ;;  %v2312_v16 = vpack.c.bf16 %v5122_v0, %v5114_v4 }
 0xbc5   : > { %v2546_v54 = vpop.f32.mrb[58].mxu0 }
 0xbc6   : > { %v2551_v45 = vmul.f32 0.35355338, %v2546_v54  ;;  %v4076_v30 = vpop.f32.mrb[59].mxu0  ;;  %v2552_v38 = vsel %vm410_vm7, -1e+09, %v2550_v20  ;;  %v4372_v20 = vld [vmem:[%s4620_s19 + $0x110] sm:$0xff]   ;;  %v5141_v54 = vrot.slane %v5022_v61, %v471_v23 }
 0xbc7   : > { %v2554_v2 = vsel %vm2434_vm8, %v2552_v38, -inf  ;;  %4110 = vmatpush3.bf16.msra.mxu0 %v4372_v20  ;;  %v4382_v20 = vld [vmem:[%s4620_s19 + $0x138] sm:$0xff]  }
 0xbc8   : > { %2555 = vmax.xlane.f32.xlu0 %v2554_v2  ;;  %v2553_v3 = vsel %vm411_vm9, -1e+09, %v2551_v45  ;;  %v4374_v2 = vld [vmem:[%s4620_s19 + $0x118] sm:$0xff]   ;;  %4111 = vmatprep.subr.bf16.mxu0 %v4539_v18 }
 0xbc9   : > { %v2557_v6 = vsel %vm2434_vm8, %v2553_v3, -inf }
 0xbca   : > { %2558 = vmax.xlane.f32.xlu1 %v2557_v6 }
 0xbcb   : > { %4112 = vmatpush3.bf16.msra.mxu0 %v4374_v2 }
 0xbcc   : > { %4113 = vmatprep.subr.bf16.mxu0 %v4539_v18 }
 0xc45   : > { %v2437_v7 = vpop.xlane.xlu0 %2436 }
 0xc46   : > { %v2441_v10 = vsub.f32 %v2432_v55, %v2437_v7  ;;  %v5124_v55 = vpop.f32.mrb[48].mxu1 }
 0xc47   : > { %v2440_v15 = vpop.xlane.xlu1 %2439 }
 0xc48   : > { %v2443_v19 = vmul.f32 1.442695, %v2441_v10  ;;  %v2442_v8 = vsub.f32 %v2433_v48, %v2440_v15  ;;  %v5128_v48 = vpop.f32.mrb[49].mxu1 }
 0xc49   : > { %v2204_v49 = vpop.f32.mrb[50].mxu1 }
 0xc4a   : > { %4444 = vpow2.f32 %v2443_v19  ;;  %v2445_v36 = vmul.f32 1.442695, %v2442_v8  ;;  %v2205_v45 = vpop.f32.mrb[51].mxu1  ;;  %v4376_v19 = vld [vmem:[%s4620_s19 + $0x120] sm:$0xff]   ;;  %v4383_v49 = vld [vmem:[%s4620_s19 + $0x168] sm:$0xff]  }
 0xc4b   : > { %v2292_v30 = vpop.f32.mrb[52].mxu1  ;;  %4114 = vmatpush3.bf16.msra.mxu0 %v4376_v19  ;;  %v4384_v45 = vld [vmem:[%s4620_s19 + $0x170] sm:$0xff]  }
 0xc4c   : > { %4446 = vpow2.f32 %v2445_v36  ;;  %v2294_v21 = vpop.f32.mrb[53].mxu1  ;;  %4115 = vmatprep.subr.bf16.mxu0 %v4539_v18 }
 0xc4d   : > { %v2296_v6 = vpop.f32.mrb[54].mxu1 }
 0xc4e   : > { %v5153_v32 = vadd.f32 %v2296_v6, %v5133_v39  ;;  %v2298_v23 = vpop.f32.mrb[55].mxu1 }
 0xc4f   : > { %v5156_v61 = vadd.f32 %v2298_v23, %v5141_v54  ;;  %v5158_v7 = vpop.f32.mrb[56].mxu1 }
 0xc50   : > { %v5162_v15 = vpop.f32.mrb[57].mxu1  ;;  %v2303_v2 = vadd.f32 %v5158_v7, %v5133_v39 }
 0xc51   : > { %v2306_v36 = vpop.f32.mrb[58].mxu1  ;;  %v2305_v51 = vadd.f32 %v5162_v15, %v5141_v54 }
 0xc53   : > { %v2324_v31 = vpack.c.bf16 %v2305_v51, %v2305_v51  ;;  %v4387_v51 = vld [vmem:[%s4620_s19 + $0x188] sm:$0xff]  }
 0xc54   : > { %v5085_v17 = vpop.eup %4444 }
 0xc55   : > { %v2556_v12 = vpop.xlane.xlu0 %2555  ;;  %v2447_v37 = vsel %vm2434_vm8, %v5085_v17, 0.0 }
 0xc56   : > { %v5089_v22 = vpop.eup %4446  ;;  %v2560_v53 = vsub.f32 %v2552_v38, %v2556_v12  ;;  %2448 = vadd.xlane.f32.xlu0 %v2447_v37  ;;  %v5145_v38 = vadd.f32 %v2292_v30, %v5133_v39  ;;  %v2307_v12 = vpop.f32.mrb[59].mxu1  ;;  %v4378_v37 = vld [vmem:[%s4620_s19 + $0x128] sm:$0xff]   ;;  %v4385_v30 = vld [vmem:[%s4620_s19 + $0x178] sm:$0xff]  }
 0xc57   : > { %v2559_v56 = vpop.xlane.xlu1 %2558  ;;  %v2450_v24 = vsel %vm2434_vm8, %v5089_v22, 0.0  ;;  %4116 = vmatpush3.bf16.msra.mxu0 %v4378_v37  ;;  %v2323_v12 = vpack.c.bf16 %v2303_v2, %v2303_v2 }
 0xc58   : > { %v2562_v25 = vmul.f32 1.442695, %v2560_v53  ;;  %v2561_v9 = vsub.f32 %v2553_v3, %v2559_v56  ;;  %2451 = vadd.xlane.f32.xlu1 %v2450_v24  ;;  %v5149_v3 = vadd.f32 %v2294_v21, %v5141_v54  ;;  %v2315_v10 = vpack.c.bf16 %v5153_v32, %v5145_v38  ;;  %v4380_v53 = vld [vmem:[%s4620_s19 + $0x130] sm:$0xff]   ;;  %4117 = vmatprep.subr.bf16.mxu0 %v4539_v18 }
 0xc59   : > { %v2879_v37 = vsel %vm2463_vm6, %v2323_v12, 0  ;;  %v2201_v38 = vadd.f32 %v5124_v55, %v5104_v40  ;;  %v2203_v40 = vadd.f32 %v5128_v48, %v5108_v41 }
 0xc5a   : > { %4448 = vpow2.f32 %v2562_v25  ;;  %v2564_v11 = vmul.f32 1.442695, %v2561_v9  ;;  %v2316_v8 = vpack.c.bf16 %v5156_v61, %v5149_v3 }
 0xc5b   : > { %4118 = vmatpush3.bf16.msra.mxu0 %v4380_v53  ;;  %v2319_v32 = vpack.c.bf16 %v2201_v38, %v2201_v38  ;;  %v2320_v46 = vpack.c.bf16 %v2203_v40, %v2203_v40  ;;  %v4386_v38 = vld [vmem:[%s4620_s19 + $0x180] sm:$0xff]  }
 0xc5c   : > { %4450 = vpow2.f32 %v2564_v11  ;;  %4119 = vmatprep.subr.bf16.mxu0 %v4539_v18  ;;  %v2254_v11 = vadd.f32 %v5057_v28, %v5046_v13 }
 0xc5e   : > { %v2322_v44 = vpack.c.bf16 %v2254_v11, %v2254_v11 }
 0xc5f   : > { %4120 = vmatpush3.bf16.msra.mxu0 %v4382_v20 }
 0xc60   : > { %v2583_v13 = vsel %vm2463_vm6, %v2322_v44, 0  ;;  %4133 = vmatprep.subr.bf16.mxu0 %v4539_v18 }
 0xc64   : > { %v5093_v58 = vpop.eup %4448 }
 0xc65   : > { %v2566_v26 = vsel %vm2434_vm8, %v5093_v58, 0.0 }
 0xc66   : > { %v5097_v27 = vpop.eup %4450  ;;  %2567 = vadd.xlane.f32.xlu0 %v2566_v26 }
 0xc67   : > { %v2569_v35 = vsel %vm2434_vm8, %v5097_v27, 0.0 }
 0xc68   : > { %2570 = vadd.xlane.f32.xlu1 %v2569_v35 }
 0xce3   : > { %v2449_v56 = vpop.xlane.xlu0 %2448 }
 0xce4   : > { %4452 = vrcp.f32 %v2449_v56 }
 0xce5   : > { %v2452_v24 = vpop.xlane.xlu1 %2451 }
 0xce6   : > { %4454 = vrcp.f32 %v2452_v24 }
 0xcee   : > { %v4453_v25 = vpop.eup %4452 }
 0xcef   : > { %v2457_v26 = vmul.f32 %v4453_v25, %v5085_v17 }
 0xcf0   : > { %v4455_v9 = vpop.eup %4454 }
 0xcf1   : > { %v2458_v35 = vmul.f32 %v4455_v9, %v5089_v22 }
 0xcf3   : > { %v2459_v29 = vpack.c.bf16 %v2458_v35, %v2457_v26  ;;  %v2568_v1 = vpop.xlane.xlu0 %2567 }
 0xcf4   : > { %4456 = vrcp.f32 %v2568_v1 }
 0xcf5   : > { %4066 = vmatmul.mubr.msk.bf16.vlgmr.msra.gmra.mrb[60].mxu1 %vm2434_vm8, %v2459_v29  ;;  %v2571_v47 = vpop.xlane.xlu1 %2570 }
 0xcf6   : > { %4078 = vmatpush3.bf16.msra.mxu1 %v2314_v33  ;;  %4458 = vrcp.f32 %v2571_v47  ;;  %4081 = vmatprep.mubr.msk.bf16.mxu1 %vm4540_vm2, %v4539_v18 }
 0xcf7   : > { %4079 = vmatprep.subr.bf16.mxu1 %v4539_v18 }
 0xcfa   : > { %4080 = vmatpush3.bf16.msra.mxu1 %v2583_v13 }
 0xcfb   : > { %4085 = vmatprep.subr.bf16.mxu1 %v4539_v18 }
 0xcfe   : > { %v4457_v28 = vpop.eup %4456 }
 0xcff   : > { %v2576_v22 = vmul.f32 %v4457_v28, %v5093_v58  ;;  %v4379_v58 = vld [vmem:[%s4620_s19 + $0x158] sm:$0xff]  }
 0xd00   : > { %v4459_v17 = vpop.eup %4458 }
 0xd01   : > { %v2577_v5 = vmul.f32 %v4459_v17, %v5097_v27  ;;  %v4381_v27 = vld [vmem:[%s4620_s19 + $0x160] sm:$0xff]  }
 0xd03   : > { %v2578_v33 = vpack.c.bf16 %v2577_v5, %v2576_v22 }
 0xd05   : > { %4082 = vmatmul.mubr.msk.bf16.vlgmr.msra.gmra.mrb[64].mxu1 %vm2434_vm8, %v2578_v33 }
 0xd06   : > { %4086 = vmatpush3.bf16.msra.mxu1 %v4373_v60  ;;  %4101 = vmatprep.mubr.msk.bf16.mxu1 %vm4540_vm2, %v4539_v18 }
 0xd07   : > { %4087 = vmatprep.subr.bf16.mxu1 %v4539_v18 }
 0xd0a   : > { %4088 = vmatpush3.bf16.msra.mxu1 %v4375_v50 }
 0xd0b   : > { %4089 = vmatprep.subr.bf16.mxu1 %v4539_v18 }
 0xd0e   : > { %4090 = vmatpush3.bf16.msra.mxu1 %v4377_v62 }
 0xd0f   : > { %4091 = vmatprep.subr.bf16.mxu1 %v4539_v18 }
 0xd12   : > { %4092 = vmatpush3.bf16.msra.mxu1 %v4379_v58 }
 0xd13   : > { %4093 = vmatprep.subr.bf16.mxu1 %v4539_v18 }
 0xd16   : > { %4094 = vmatpush3.bf16.msra.mxu1 %v4381_v27 }
 0xd17   : > { %4095 = vmatprep.subr.bf16.mxu1 %v4539_v18 }
 0xd1a   : > { %4096 = vmatpush3.bf16.msra.mxu1 %v4383_v49 }
 0xd1b   : > { %4097 = vmatprep.subr.bf16.mxu1 %v4539_v18 }
 0xd1e   : > { %4098 = vmatpush3.bf16.msra.mxu1 %v4384_v45 }
 0xd1f   : > { %4099 = vmatprep.subr.bf16.mxu1 %v4539_v18 }
 0xd22   : > { %4100 = vmatpush3.bf16.msra.mxu1 %v4385_v30 }
 0xd23   : > { %4125 = vmatprep.subr.bf16.mxu1 %v4539_v18 }
 0xdc8   : > { %v2501_v21 = vpop.f32.mrb[60].mxu1 }
 0xdc9   : > { %v4067_v6 = vpop.f32.mrb[61].mxu1 }
 0xdca   : > { %v2504_v23 = vpop.f32.mrb[62].mxu1 }
 0xdcb   : > { %v2508_v19 = vpack.c.bf16 %v2504_v23, %v2501_v21  ;;  %v4068_v36 = vpop.f32.mrb[63].mxu1 }
 0xdcd   : > { %4122 = vmatmul.mubr.bf16.vlgmr.msra.gmra.mrb[60].mxu0 %v2508_v19 }
 0xdce   : > { %4134 = vmatpush3.bf16.msra.mxu0 %v2315_v10  ;;  %4137 = vmatprep.mubr.msk.bf16.mxu0 %vm4540_vm2, %v4539_v18 }
 0xdcf   : > { %4135 = vmatprep.subr.bf16.mxu0 %v4539_v18 }
 0xdd2   : > { %4136 = vmatpush3.bf16.msra.mxu0 %v2879_v37 }
 0xdd3   : > { %4141 = vmatprep.subr.bf16.mxu0 %v4539_v18 }
 0xdd8   : > { %v2619_v39 = vpop.f32.mrb[64].mxu1 }
 0xdd9   : > { %v4083_v7 = vpop.f32.mrb[65].mxu1 }
 0xdda   : > { %v2622_v53 = vpop.f32.mrb[66].mxu1 }
 0xddb   : > { %v2626_v56 = vpack.c.bf16 %v2622_v53, %v2619_v39  ;;  %v4084_v24 = vpop.f32.mrb[67].mxu1 }
 0xddd   : > { %4102 = vmatmul.mubr.bf16.vlgmr.msra.gmra.mrb[68].mxu1 %v2626_v56 }
 0xdde   : > { %4126 = vmatpush3.bf16.xpose.msra.mxu1 %v2311_v59  ;;  %4129 = vmatprep.mubr.msk.bf16.mxu1 %vm4540_vm2, %v4539_v18 }
 0xddf   : > { %4127 = vmatprep.subr.bf16.mxu1 %v4539_v18 }
 0xde6   : > { %4128 = vmatpush3.bf16.xpose.msra.mxu1 %v2319_v32 }
 0xde7   : > { %4161 = vmatprep.subr.bf16.mxu1 %v4539_v18 }
 0xded   : > { %4130 = vmatmul.mubr.bf16.vlgmr.msra.gmra.mrb[72].mxu1 %v1951_v63  ;;  %v3088_v63 = vsel %vm2463_vm6, %v2324_v31, 0  ;;  %v4388_v31 = vld [vmem:[%s4620_s19 + $0x190] sm:$0xff]  }
 0xdee   : > { %4162 = vmatpush3.bf16.xpose.msra.mxu1 %v2312_v16  ;;  %4165 = vmatprep.mubr.msk.bf16.mxu1 %vm4540_vm2, %v4539_v18 }
 0xdef   : > { %4163 = vmatprep.subr.bf16.mxu1 %v4539_v18 }
 0xdf6   : > { %4164 = vmatpush3.bf16.xpose.msra.mxu1 %v2320_v46 }
 0xdf7   : > { %4169 = vmatprep.subr.bf16.mxu1 %v4539_v18 }
 0xdfd   : > { %4166 = vmatmul.mubr.bf16.vlgmr.msra.gmra.mrb[76].mxu1 %v1952_v14 }
 0xdfe   : > { %4170 = vmatpush3.bf16.msra.mxu1 %v2316_v8  ;;  %4173 = vmatprep.mubr.msk.bf16.mxu1 %vm4540_vm2, %v4539_v18 }
 0xdff   : > { %4171 = vmatprep.subr.bf16.mxu1 %v4539_v18 }
 0xe02   : > { %4172 = vmatpush3.bf16.msra.mxu1 %v3088_v63 }
 0xe03   : > { %4177 = vmatprep.subr.bf16.mxu1 %v4539_v18 }
 0xea0   : > { %v2798_v41 = vpop.f32.mrb[60].mxu0 }
 0xea1   : > { %v4123_v4 = vpop.f32.mrb[61].mxu0 }
 0xea2   : > { %v2801_v52 = vpop.f32.mrb[62].mxu0 }
 0xea3   : > { %v4124_v0 = vpop.f32.mrb[63].mxu0 }
 0xeb0   : > { %v2709_v34 = vpop.f32.mrb[68].mxu1 }
 0xeb1   : > { %v5253_v57 = vadd.f32 %v2798_v41, %v2709_v34  ;;  %v4103_v14 = vpop.f32.mrb[69].mxu1  ;;  %v4389_v41 = vld [vmem:[%s4620_s19 + $0x198] sm:$0xff]   ;;  %v4390_v34 = vld [vmem:[%s4620_s19 + $0x1a0] sm:$0xff]  }
 0xeb2   : > { %v2712_v55 = vpop.f32.mrb[70].mxu1  ;;  %v4391_v14 = vld [vmem:[%s4620_s19 + $0x1c0] sm:$0xff]  }
 0xeb3   : > { %v5255_v59 = vadd.f32 %v2801_v52, %v2712_v55  ;;  %v4104_v48 = vpop.f32.mrb[71].mxu1 }
 0xeb4   : > { %v4392_v48 = vld [vmem:[%s4620_s19 + $0x1a8] sm:$0xff]  }
 0xec0   : > { %v2839_v16 = vpop.f32.mrb[72].mxu1 }
 0xec1   : > { %v2846_v54 = vmul.f32 0.35355338, %v2839_v16  ;;  %v4131_v3 = vpop.f32.mrb[73].mxu1  ;;  %v4393_v16 = vld [vmem:[%s4620_s19 + $0x1c8] sm:$0xff]  }
 0xec2   : > { %v2842_v61 = vpop.f32.mrb[74].mxu1  ;;  %v4395_v3 = vld [vmem:[%s4620_s19 + $0x1d0] sm:$0xff]  }
 0xec3   : > { %v2847_v10 = vmul.f32 0.35355338, %v2842_v61  ;;  %v4132_v15 = vpop.f32.mrb[75].mxu1  ;;  %v2848_v8 = vsel %vm410_vm7, -1e+09, %v2846_v54  ;;  %v4394_v54 = vld [vmem:[%s4620_s19 + $0x1b0] sm:$0xff]  }
 0xec4   : > { %v2850_v25 = vsel %vm2434_vm8, %v2848_v8, -inf  ;;  %v4396_v61 = vld [vmem:[%s4620_s19 + $0x1b8] sm:$0xff]   ;;  %v4398_v15 = vld [vmem:[%s4620_s19 + $0x1e0] sm:$0xff]  }
 0xec5   : > { %2851 = vmax.xlane.f32.xlu0 %v2850_v25  ;;  %v2849_v9 = vsel %vm411_vm9, -1e+09, %v2847_v10  ;;  %v4397_v10 = vld [vmem:[%s4620_s19 + $0x1d8] sm:$0xff]   ;;  %v4400_v25 = vld [vmem:[%s4620_s19 + $0x1f0] sm:$0xff]  }
 0xec6   : > { %v2853_v11 = vsel %vm2434_vm8, %v2849_v9, -inf }
 0xec7   : > { %2854 = vmax.xlane.f32.xlu1 %v2853_v11 }
 0xed0   : > { %v3048_v26 = vpop.f32.mrb[76].mxu1 }
 0xed1   : > { %v3055_v35 = vmul.f32 0.35355338, %v3048_v26  ;;  %v4167_v29 = vpop.f32.mrb[77].mxu1 }
 0xed2   : > { %v3051_v1 = vpop.f32.mrb[78].mxu1 }
 0xed3   : > { %v3056_v44 = vmul.f32 0.35355338, %v3051_v1  ;;  %v4168_v47 = vpop.f32.mrb[79].mxu1  ;;  %v3057_v13 = vsel %vm410_vm7, -1e+09, %v3055_v35 }
 0xed4   : > { %v3059_v28 = vsel %vm2434_vm8, %v3057_v13, -inf }
 0xed5   : > { %3060 = vmax.xlane.f32.xlu0 %v3059_v28  ;;  %v3058_v17 = vsel %vm411_vm9, -1e+09, %v3056_v44 }
 0xed6   : > { %v3062_v22 = vsel %vm2434_vm8, %v3058_v17, -inf }
 0xed7   : > { %3063 = vmax.xlane.f32.xlu1 %v3062_v22  ;;  %v4402_v22 = vld [vmem:[%s4615_s15 + $0x60] ss:$100 sps:$4 sm:$0xff]  }
 0xf52   : > { %v2852_v5 = vpop.xlane.xlu0 %2851 }
 0xf53   : > { %v2856_v60 = vsub.f32 %v2848_v8, %v2852_v5  ;;  %v4399_v8 = vld [vmem:[%s4620_s19 + $0x1e8] sm:$0xff]  }
 0xf54   : > { %v2855_v33 = vpop.xlane.xlu1 %2854  ;;  %v4403_v5 = vld [vmem:[%s4615_s15 + $0x128] ss:$100 sps:$4 sm:$0xff]  }
 0xf55   : > { %v2858_v50 = vmul.f32 1.442695, %v2856_v60  ;;  %v2857_v62 = vsub.f32 %v2849_v9, %v2855_v33  ;;  %v4401_v9 = vld [vmem:[%s4620_s19 + $0x1f8] sm:$0xff]  }
 0xf57   : > { %4460 = vpow2.f32 %v2858_v50  ;;  %v2860_v58 = vmul.f32 1.442695, %v2857_v62 }
 0xf59   : > { %4462 = vpow2.f32 %v2860_v58 }
 0xf61   : > { %v4461_v27 = vpop.eup %4460 }
 0xf62   : > { %v3061_v42 = vpop.xlane.xlu0 %3060  ;;  %v2862_v20 = vsel %vm2434_vm8, %v4461_v27, 0.0 }
 0xf63   : > { %v4463_v49 = vpop.eup %4462  ;;  %v3065_v45 = vsub.f32 %v3057_v13, %v3061_v42  ;;  %2863 = vadd.xlane.f32.xlu0 %v2862_v20 }
 0xf64   : > { %v3064_v43 = vpop.xlane.xlu1 %3063  ;;  %v2865_v30 = vsel %vm2434_vm8, %v4463_v49, 0.0 }
 0xf65   : > { %v3067_v21 = vmul.f32 1.442695, %v3065_v45  ;;  %v3066_v2 = vsub.f32 %v3058_v17, %v3064_v43  ;;  %2866 = vadd.xlane.f32.xlu1 %v2865_v30  ;;  %v3778_v45 = vld [vmem:[%s4625_s22 + $0x1a] ss:$0 sm:$0xff] }
 0xf67   : > { %4464 = vpow2.f32 %v3067_v21  ;;  %v3069_v6 = vmul.f32 1.442695, %v3066_v2 }
 0xf69   : > { %4466 = vpow2.f32 %v3069_v6 }
 0xf71   : > { %v4465_v23 = vpop.eup %4464 }
 0xf72   : > { %v3071_v19 = vsel %vm2434_vm8, %v4465_v23, 0.0 }
 0xf73   : > { %v4467_v36 = vpop.eup %4466  ;;  %3072 = vadd.xlane.f32.xlu0 %v3071_v19  ;;  %v4406_v19 = vld [vmem:[%s4620_s19 + $0x210] sm:$0xff]  }
 0xf74   : > { %v3074_v12 = vsel %vm2434_vm8, %v4467_v36, 0.0 }
 0xf75   : > { %3075 = vadd.xlane.f32.xlu1 %v3074_v12  ;;  %v4408_v12 = vld [vmem:[%s4620_s19 + $0x220] sm:$0xff]  }
 0xff0   : > { %v2864_v37 = vpop.xlane.xlu0 %2863 }
 0xff1   : > { %4468 = vrcp.f32 %v2864_v37  ;;  %v4409_v37 = vld [vmem:[%s4620_s19 + $0x228] sm:$0xff]  }
 0xff2   : > { %v2867_v39 = vpop.xlane.xlu1 %2866 }
 0xff3   : > { %4470 = vrcp.f32 %v2867_v39  ;;  %v4410_v39 = vld [vmem:[%s4620_s19 + $0x230] sm:$0xff]  }
 0xffb   : > { %v4469_v7 = vpop.eup %4468 }
 0xffc   : > { %v2872_v56 = vmul.f32 %v4469_v7, %v4461_v27  ;;  %v4411_v7 = vld [vmem:[%s4620_s19 + $0x238] sm:$0xff]  }
 0xffd   : > { %v4471_v53 = vpop.eup %4470 }
 0xffe   : > { %v2873_v24 = vmul.f32 %v4471_v53, %v4463_v49  ;;  %v3779_v53 = vld [vmem:[%s4625_s22 + $0x18] ss:$0 sm:$0xff] }
0x1000   : > { %v3073_v32 = vpop.xlane.xlu0 %3072  ;;  %v2874_v40 = vpack.c.bf16 %v2873_v24, %v2872_v56 }
0x1001   : > { %4472 = vrcp.f32 %v3073_v32 }
0x1002   : > { %4138 = vmatmul.mubr.msk.bf16.vlgmr.msra.gmra.mrb[64].mxu0 %vm2434_vm8, %v2874_v40  ;;  %v3076_v46 = vpop.xlane.xlu1 %3075 }
0x1003   : > { %4474 = vrcp.f32 %v3076_v46  ;;  %4142 = vmatpush3.bf16.msra.mxu0 %v4386_v38  ;;  %4157 = vmatprep.mubr.msk.bf16.mxu0 %vm4540_vm2, %v4539_v18 }
0x1004   : > { %4143 = vmatprep.subr.bf16.mxu0 %v4539_v18 }
0x1007   : > { %4144 = vmatpush3.bf16.msra.mxu0 %v4387_v51 }
0x1008   : > { %4145 = vmatprep.subr.bf16.mxu0 %v4539_v18 }
0x100b   : > { %v4473_v63 = vpop.eup %4472  ;;  %4146 = vmatpush3.bf16.msra.mxu0 %v4388_v31 }
0x100c   : > { %4147 = vmatprep.subr.bf16.mxu0 %v4539_v18  ;;  %v3081_v52 = vmul.f32 %v4473_v63, %v4465_v23  ;;  %v4404_v23 = vld [vmem:[%s4620_s19 + $0x200] sm:$0xff]  }
0x100d   : > { %v4475_v4 = vpop.eup %4474 }
0x100e   : > { %v3082_v0 = vmul.f32 %v4475_v4, %v4467_v36  ;;  %v4407_v36 = vld [vmem:[%s4620_s19 + $0x218] sm:$0xff]  }
0x100f   : > { %4148 = vmatpush3.bf16.msra.mxu0 %v4389_v41  ;;  %v3783_v41 = vld [vmem:[%s4625_s22 + $0x1b] ss:$0 sm:$0xff] }
0x1010   : > { %v3083_v55 = vpack.c.bf16 %v3082_v0, %v3081_v52  ;;  %4149 = vmatprep.subr.bf16.mxu0 %v4539_v18 }
0x1012   : > { %4174 = vmatmul.mubr.msk.bf16.vlgmr.msra.gmra.mrb[80].mxu1 %vm2434_vm8, %v3083_v55 }
0x1013   : > { %4150 = vmatpush3.bf16.msra.mxu0 %v4390_v34  ;;  %4178 = vmatpush3.bf16.msra.mxu1 %v4391_v14 }
0x1014   : > { %4151 = vmatprep.subr.bf16.mxu0 %v4539_v18  ;;  %4179 = vmatprep.subr.bf16.mxu1 %v4539_v18 }
0x1015   : > { %4193 = vmatprep.mubr.msk.bf16.mxu1 %vm4540_vm2, %v4539_v18 }
0x1017   : > { %4152 = vmatpush3.bf16.msra.mxu0 %v4392_v48  ;;  %4180 = vmatpush3.bf16.msra.mxu1 %v4393_v16 }
0x1018   : > { %4153 = vmatprep.subr.bf16.mxu0 %v4539_v18  ;;  %4181 = vmatprep.subr.bf16.mxu1 %v4539_v18 }
0x101b   : > { %4154 = vmatpush3.bf16.msra.mxu0 %v4394_v54  ;;  %4182 = vmatpush3.bf16.msra.mxu1 %v4395_v3 }
0x101c   : > { %4155 = vmatprep.subr.bf16.mxu0 %v4539_v18  ;;  %4183 = vmatprep.subr.bf16.mxu1 %v4539_v18 }
0x101f   : > { %4156 = vmatpush3.bf16.msra.mxu0 %v4396_v61  ;;  %4184 = vmatpush3.bf16.msra.mxu1 %v4397_v10 }
0x1020   : > { %4185 = vmatprep.subr.bf16.mxu1 %v4539_v18  ;;  %4197 = vmatprep.subr.bf16.mxu0 %v4539_v18 }
0x1023   : > { %4186 = vmatpush3.bf16.msra.mxu1 %v4398_v15 }
0x1024   : > { %4187 = vmatprep.subr.bf16.mxu1 %v4539_v18 }
0x1027   : > { %4188 = vmatpush3.bf16.msra.mxu1 %v4399_v8 }
0x1028   : > { %4189 = vmatprep.subr.bf16.mxu1 %v4539_v18 }
0x102b   : > { %4190 = vmatpush3.bf16.msra.mxu1 %v4400_v25 }
0x102c   : > { %4191 = vmatprep.subr.bf16.mxu1 %v4539_v18 }
0x102f   : > { %4192 = vmatpush3.bf16.msra.mxu1 %v4401_v9 }
0x10d5   : > { %v2915_v11 = vpop.f32.mrb[64].mxu0 }
0x10d6   : > { %v4139_v26 = vpop.f32.mrb[65].mxu0 }
0x10d7   : > { %v2918_v35 = vpop.f32.mrb[66].mxu0 }
0x10d8   : > { %v2922_v29 = vpack.c.bf16 %v2918_v35, %v2915_v11  ;;  %v4140_v1 = vpop.f32.mrb[67].mxu0 }
0x10da   : > { %4158 = vmatmul.mubr.bf16.vlgmr.msra.gmra.mrb[68].mxu0 %v2922_v29 }
0x10db   : > { %4201 = vmatprep.mubr.msk.bf16.mxu0 %vm4540_vm2, %v4539_v18  ;;  %4198 = vmatpush3.bf16.msra.mxu0 %v4402_v22  ;;  %v3792_v22 = vld [vmem:[%s4625_s22 + $0x1c] ss:$0 sm:$0xff] }
0x10dc   : > { %4199 = vmatprep.subr.bf16.mxu0 %v4539_v18 }
0x10df   : > { %4200 = vmatpush3.bf16.msra.mxu0 %v4403_v5 }
0x10e0   : > { %4205 = vmatprep.subr.bf16.mxu0 %v4539_v18 }
0x10e5   : > { %v3124_v44 = vpop.f32.mrb[80].mxu1 }
0x10e6   : > { %v4175_v47 = vpop.f32.mrb[81].mxu1 }
0x10e7   : > { %v3127_v13 = vpop.f32.mrb[82].mxu1 }
0x10e8   : > { %v3131_v28 = vpack.c.bf16 %v3127_v13, %v3124_v44  ;;  %v4176_v17 = vpop.f32.mrb[83].mxu1 }
0x10ea   : > { %4194 = vmatmul.mubr.bf16.vlgmr.msra.gmra.mrb[84].mxu1 %v3131_v28 }
0x11ad   : > { %v3005_v60 = vpop.f32.mrb[68].mxu0 }
0x11ae   : > { %v3012_v33 = vadd.f32 %v3005_v60, %v5253_v57  ;;  %v4159_v50 = vpop.f32.mrb[69].mxu0 }
0x11af   : > { %v3008_v62 = vpop.f32.mrb[70].mxu0 }
0x11b0   : > { %v3013_v58 = vadd.f32 %v3008_v62, %v5255_v59  ;;  %v4160_v27 = vpop.f32.mrb[71].mxu0  ;;  %v4405_v59 = vld [vmem:[%s4620_s19 + $0x208] sm:$0xff]  }
0x11bd   : > { %v3214_v42 = vpop.f32.mrb[84].mxu1 }
0x11be   : > { %v3221_v20 = vadd.f32 %v3214_v42, %v3012_v33  ;;  %v4195_v49 = vpop.f32.mrb[85].mxu1  ;;  %v3793_v33 = vld [vmem:[%s4625_s22 + $0x1d] ss:$0 sm:$0xff] }
0x11bf   : > { %v3217_v43 = vpop.f32.mrb[86].mxu1 }
0x11c0   : > { %v3222_v30 = vadd.f32 %v3217_v43, %v3013_v58  ;;  %v4196_v21 = vpop.f32.mrb[87].mxu1  ;;  %v3230_v2 = vadd.f32 %v3778_v45, %v3221_v20 }
0x11c2   : > { %v3231_v6 = vadd.f32 %v3778_v45, %v3222_v30 }
0x11c4   : > { %v3232_v57 = vpack.c.bf16 %v3231_v6, %v3230_v2 }
0x11c6   : > { %4202 = vmatmul.mubr.msk.bf16.vlgmr.msra.gmra.mrb[72].mxu0 %vm621_vm1, %v3232_v57 }
0x11c7   : > { %4206 = vmatpush3.bf16.msra.mxu0 %v4404_v23  ;;  %4221 = vmatprep.mubr.msk.bf16.mxu0 %vm4540_vm2, %v4539_v18 }
0x11c8   : > { %4207 = vmatprep.subr.bf16.mxu0 %v4539_v18 }
0x11cb   : > { %4208 = vmatpush3.bf16.msra.mxu0 %v4405_v59 }
0x11cc   : > { %4209 = vmatprep.subr.bf16.mxu0 %v4539_v18 }
0x11cf   : > { %4210 = vmatpush3.bf16.msra.mxu0 %v4406_v19 }
0x11d0   : > { %4211 = vmatprep.subr.bf16.mxu0 %v4539_v18 }
0x11d3   : > { %4212 = vmatpush3.bf16.msra.mxu0 %v4407_v36 }
0x11d4   : > { %4213 = vmatprep.subr.bf16.mxu0 %v4539_v18 }
0x11d7   : > { %4214 = vmatpush3.bf16.msra.mxu0 %v4408_v12 }
0x11d8   : > { %4215 = vmatprep.subr.bf16.mxu0 %v4539_v18 }
0x11db   : > { %4216 = vmatpush3.bf16.msra.mxu0 %v4409_v37 }
0x11dc   : > { %4217 = vmatprep.subr.bf16.mxu0 %v4539_v18 }
0x11df   : > { %4218 = vmatpush3.bf16.msra.mxu0 %v4410_v39 }
0x11e0   : > { %4219 = vmatprep.subr.bf16.mxu0 %v4539_v18 }
0x11e3   : > { %4220 = vmatpush3.bf16.msra.mxu0 %v4411_v7 }
0x1299   : > { %v3293_v56 = vpop.f32.mrb[72].mxu0 }
0x129a   : > { %v3294_v24 = vadd.f32 %v3779_v53, %v3293_v56  ;;  %v4203_v38 = vpop.f32.mrb[73].mxu0 }
0x129b   : > { %v3296_v32 = vpop.f32.mrb[74].mxu0 }
0x129c   : > { %v3297_v40 = vadd.f32 %v3779_v53, %v3296_v32  ;;  %v4204_v46 = vpop.f32.mrb[75].mxu0  ;;  %v3300_v51 = vmax.f32 %v3294_v24, 0.0  ;;  %v3795_v24 = vld [vmem:[%s5404_s7] ss:$0 sm:$0xff] (!%p3794_p6)  ;;  %v3796_v32 = vld [vmem:[%s5404_s7 + $0x1] ss:$0 sm:$0xff] (!%p3794_p6) }
0x129e   : > { %v3301_v31 = vmax.f32 %v3297_v40, 0.0 }
0x12a0   : > { %v3302_v63 = vpack.c.bf16 %v3301_v31, %v3300_v51 }
0x12a2   : > { %4222 = vmatmul.mubr.bf16.vlgmr.msra.gmra.mrb[76].mxu0 %v3302_v63 }
0x1375   : > { %v3408_v4 = vpop.f32.mrb[76].mxu0 }
0x1376   : > { %v3409_v52 = vadd.f32 %v3783_v41, %v3408_v4  ;;  %v4223_v0 = vpop.f32.mrb[77].mxu0 }
0x1377   : > { %v3411_v34 = vpop.f32.mrb[78].mxu0 }
0x1378   : > { %v3412_v14 = vadd.f32 %v3783_v41, %v3411_v34  ;;  %v4224_v18 = vpop.f32.mrb[79].mxu0  ;;  %v3415_v55 = vadd.f32 %v3409_v52, %v3230_v2 }
0x137a   : > { %v3419_v48 = vsel %vm621_vm1, %v3415_v55, 0.0  ;;  %v3416_v16 = vadd.f32 %v3412_v14, %v3231_v6 }
0x137b   : > { %3420 = vadd.xlane.f32.xlu0 %v3419_v48 }
0x137c   : > { %v3422_v54 = vsel %vm621_vm1, %v3416_v16, 0.0 }
0x137d   : > { %3423 = vadd.xlane.f32.xlu1 %v3422_v54 }
0x1408   : > { %v3421_v3 = vpop.xlane.xlu0 %3420 }
0x1409   : > { %v3426_v61 = vmul.f32 0.03125, %v3421_v3 }
0x140a   : > { %v3424_v10 = vpop.xlane.xlu1 %3423 }
0x140b   : > { %v3428_v15 = vsub.f32 %v3415_v55, %v3426_v61  ;;  %v3427_v8 = vmul.f32 0.03125, %v3424_v10 }
0x140d   : > { %v3429_v25 = vsub.f32 %v3416_v16, %v3427_v8  ;;  %v3430_v9 = vmul.f32 %v3428_v15, %v3428_v15 }
0x140f   : > { %v3432_v11 = vsel %vm621_vm1, %v3430_v9, 0.0  ;;  %v3431_v26 = vmul.f32 %v3429_v25, %v3429_v25 }
0x1410   : > { %3433 = vadd.xlane.f32.xlu0 %v3432_v11 }
0x1411   : > { %v3435_v35 = vsel %vm621_vm1, %v3431_v26, 0.0 }
0x1412   : > { %3436 = vadd.xlane.f32.xlu1 %v3435_v35 }
0x149d   : > { %v3434_v29 = vpop.xlane.xlu0 %3433 }
0x149e   : > { %v3438_v1 = vmul.f32 0.03125, %v3434_v29 }
0x149f   : > { %v3437_v44 = vpop.xlane.xlu1 %3436 }
0x14a0   : > { %v3440_v47 = vadd.f32 1e-05, %v3438_v1  ;;  %v3439_v13 = vmul.f32 0.03125, %v3437_v44 }
0x14a2   : > { %4476 = vrsqrt.f32 %v3440_v47  ;;  %v3441_v28 = vadd.f32 1e-05, %v3439_v13 }
0x14a4   : > { %4478 = vrsqrt.f32 %v3441_v28 }
0x14ac   : > { %v4477_v17 = vpop.eup %4476 }
0x14ad   : > { %v3444_v5 = vmul.f32 %v4477_v17, %v3428_v15 }
0x14ae   : > { %v4479_v60 = vpop.eup %4478 }
0x14af   : > { %v3452_v50 = vmul.f32 %v3792_v22, %v3444_v5  ;;  %v3445_v62 = vmul.f32 %v4479_v60, %v3429_v25  ;;  %3467 = sbr.rel (%p3794_p6) target bundleno = 5617 (0x15f1), region = 60 }
0x14b1   : > { %v3460_v58 = vadd.f32 %v3793_v33, %v3452_v50  ;;  %v3453_v27 = vmul.f32 %v3792_v22, %v3445_v62 }
0x14b3   : > { %3462 = vst.msk [vmem:[#allocation2] sm:$0xff] %vm621_vm1, %v3460_v58  ;;  %v3461_v42 = vadd.f32 %v3793_v33, %v3453_v27  ;;  %v3470_v20 = vsel (!%p3794_p6), %vm621_vm1, %v3460_v58, 0.0 }
0x14b4   : > { %3471 = vadd.xlane.f32.xlu0 (!%p3794_p6), %v3470_v20 }
0x14b5   : > { %3463 = vst.msk [vmem:[#allocation2 + $0x8] sm:$0xff] %vm621_vm1, %v3461_v42  ;;  %v3473_v49 = vsel (!%p3794_p6), %vm621_vm1, %v3461_v42, 0.0 }
0x14b8   : > { %3474 = vadd.xlane.f32.xlu0 %v3473_v49 }
0x1541   : > { %v3472_v45 = vpop.xlane.xlu0 %3471 }
0x1542   : > { %v3476_v43 = vmul.f32 0.03125, %v3472_v45 }
0x1544   : > { %v3478_v30 = vsub.f32 %v3460_v58, %v3476_v43 }
0x1545   : > { %v3475_v21 = vpop.xlane.xlu0 %3474 }
0x1546   : > { %v3477_v2 = vmul.f32 0.03125, %v3475_v21  ;;  %v3480_v6 = vmul.f32 %v3478_v30, %v3478_v30 }
0x1548   : > { %v3479_v23 = vsub.f32 %v3461_v42, %v3477_v2  ;;  %v3482_v57 = vsel %vm621_vm1, %v3480_v6, 0.0 }
0x1549   : > { %3483 = vadd.xlane.f32.xlu1 %v3482_v57 }
0x154a   : > { %v3481_v59 = vmul.f32 %v3479_v23, %v3479_v23 }
0x154c   : > { %v3485_v19 = vsel %vm621_vm1, %v3481_v59, 0.0 }
0x154d   : > { %3486 = vadd.xlane.f32.xlu1 %v3485_v19 }
0x15d6   : > { %v3484_v36 = vpop.xlane.xlu1 %3483 }
0x15d7   : > { %v3488_v12 = vmul.f32 0.03125, %v3484_v36 }
0x15d9   : > { %v3490_v37 = vadd.f32 1e-05, %v3488_v12 }
0x15da   : > { %v3487_v39 = vpop.xlane.xlu1 %3486 }
0x15db   : > { %4480 = vrsqrt.f32 %v3490_v37  ;;  %v3489_v7 = vmul.f32 0.03125, %v3487_v39 }
0x15dd   : > { %v3491_v53 = vadd.f32 1e-05, %v3489_v7 }
0x15df   : > { %4482 = vrsqrt.f32 %v3491_v53 }
0x15e5   : > { %v4481_v56 = vpop.eup %4480 }
0x15e6   : > { %v3494_v38 = vmul.f32 %v4481_v56, %v3478_v30 }
0x15e8   : > { %v3502_v40 = vmul.f32 %v3795_v24, %v3494_v38 }
0x15e9   : > { %v4483_v46 = vpop.eup %4482 }
0x15ea   : > { %v3510_v51 = vadd.f32 %v3796_v32, %v3502_v40  ;;  %v3495_v31 = vmul.f32 %v4483_v46, %v3479_v23 }
0x15ec   : > { %3512 = vst.msk [vmem:[#allocation3] sm:$0xff] %vm621_vm1, %v3510_v51  ;;  %v3503_v63 = vmul.f32 %v3795_v24, %v3495_v31 }
0x15ee   : > { %v3511_v41 = vadd.f32 %v3796_v32, %v3503_v63 }
0x15f0   : > { %3513 = vst.msk [vmem:[#allocation3 + $0x8] sm:$0xff] %vm621_vm1, %v3511_v41 }
0x15f1 PF: > { %p5362_p7 = scmp.eq.s32.totalorder %s3630_s30, 1  ;;  %s4541_s26 = smov [#allocation3]  }
0x15f2   : > { %s3523_s10 = sshll.u32 %s4541_s26, 4  ;;  %s3524_s10 = int_to_ptr.vmem [resolvable:$true] %s3523_s10 }
0x15f3   : > { %s4484_s11 = scalar_lea.vmem %s3524_s10, 256  ;;  %p4491_p11 = scmp.lt.s32.totalorder %s3524_s10, %s3524_s10 }
0x15f4   : > { %p4485_p8 = scmp.ne.s32.totalorder %s3524_s10, %s4484_s11  ;;  %p4492_p12 = scmp.lt.s32.totalorder %s4484_s11, %s4484_s11 }
0x15f6   : > { %p4486_p9 = pnand %p4485_p8, %p5362_p7  ;;  %p4493_p13 = por %p4492_p12, %p4491_p11 }
0x15f8   : > { %p4487_p10 = pneg %p4486_p9 }
0x15fa   : > { %p4494_p0 = pnand %p4493_p13, %p4487_p10 }
0x15fc   : > { %4497 = shalt.err (!%p4494_p0)
}
0x15fd   : > { %s4498_s30 = scalar_lea.hbm %s5405_s8, 256 }
0x15fe   : > { %p4499_p1 = scmp.ne.s32.totalorder %s5405_s8, %s4498_s30  ;;  %p4504_p4 = scmp.lt.u32.totalorder %s4498_s30, %s5405_s8 }
0x1600   : > { %p4500_p2 = pnand %p4499_p1, %p5362_p7 }
0x1602   : > { %p4501_p3 = pneg %p4500_p2 }
0x1604   : > { %p4506_p5 = pnand %p4504_p4, %p4501_p3 }
0x1606   : > { %4509 = shalt.err (!%p4506_p5)
}
0x1607   : > { %s4542_s20 = smov 128   ;;  %s4543_s21 = smov 8  }
0x1608   : > { %4229 = dma.vmem_to_hbm [thread:$0]  (%p5362_p7), %s3524_s10, 256, %s5405_s8, [#allocation4], %s4542_s20, %s4542_s20, %s4543_s21  }
0x1609   : > { %4523 = dma.done.wait (%p5362_p7), [#allocation4], 256  }
0x160a   : > { %4525 = vsyncadd (%p5362_p7), [#allocation4], 4294967040 }
0x160b PF: > { %s19_s29 = sadd.s32 1, %s4536_s29   ;;  %s5407_s27 = smov %s4532_s28 }
0x160c   : > { %p16_p6 = scmp.ge.s32.totalorder %s19_s29, 4   ;;  %s5408_s28 = smov %s5410_s9 }
0x160e   :  { %18 = sbr.rel (!%p16_p6) target bundleno = 2 (0x2), region = 100 }
0x1615   :  { %3539 = vsyncpa [#allocation4], 1 }
0x1616   :  { %3541 = vsyncpa [#allocation4 + $0x1], 1 }

</bundles_post_ra>
